<compile_context>
chip_gen: v6e
topology: v6e:2x2x1
jax: 0.10.0
libtpu: 0.0.40
codegen_flags: <defaults>
</compile_context>

<pallas_src>
import functools

import jax
import jax.numpy as jnp
from jax.experimental import pallas as pl
from jax.experimental.pallas import tpu as pltpu

HEADS, KK, UU, MM = 4, 16, 1, 23      # LambdaConv(heads, k, u, m) defaults


# ----------------------------------------------------------------------------
# Fused bottleneck kernel: one batch element per grid step.
# ----------------------------------------------------------------------------
def _bottleneck_kernel(x_ref, w1_ref, b1_ref, wqkv_ref, bqkv_ref, wefft_ref,
                       s2_ref, b2_ref, w3_ref, b3_ref, o_ref, *, heads, kk, vv):
    x_f32 = x_ref[0]                                        # (Cin, N) float32
    n = x_f32.shape[-1]

    # conv1 + bn1 + relu (BN folded into weight / bias).
    out1 = jnp.dot(w1_ref[...], x_f32.astype(jnp.bfloat16),
                   preferred_element_type=jnp.float32)
    out1 = jnp.maximum(out1 + b1_ref[...], 0.0)             # (planes, N)

    # Stacked q / k / v projection (+ folded BN on q and v): one MXU matmul.
    qkv = jnp.dot(wqkv_ref[...], out1.astype(jnp.bfloat16),
                  preferred_element_type=jnp.float32) + bqkv_ref[...]
    q = qkv[:heads * kk, :]                                 # (heads*kk, N)
    keys = qkv[heads * kk:heads * kk + kk, :]               # (kk, N)
    vals = qkv[heads * kk + kk:heads * kk + kk + vv, :]     # (vv, N)

    # Softmax over spatial positions (lane axis); divide on the EUP.
    e = jnp.exp(keys - jnp.max(keys, axis=-1, keepdims=True))
    sm = e * pl.reciprocal(jnp.sum(e, axis=-1, keepdims=True), approx=True)

    # lambda_c[v, k] = sum_n vals[v, n] * softmax[k, n]
    # (transpose folded into dot_general -- no materialized sm.T).
    lam_c = jax.lax.dot_general(vals, sm, (((1,), (1,)), ((), ())),
                                preferred_element_type=jnp.float32)   # (vv, kk)

    # lambda_p via the precomputed dense local-context operator, one lane-dense
    # matmul: lam_p[v, k*N + n] = sum_n' vals[v, n'] * Weff^T[n', k*N + n]
    lam_p = jnp.dot(vals.astype(jnp.bfloat16), wefft_ref[...],
                    preferred_element_type=jnp.float32)     # (vv, kk*N)

    # Per content-key lambda = positional + content part (lane-broadcast add).
    lam = [lam_p[:, k * n:(k + 1) * n] + lam_c[:, k:k + 1] for k in range(kk)]

    # y[h*vv + v, n] = sum_k q[h*kk + k, n] * lam[k][v, n]
    head_outs = []
    for h in range(heads):                                  # static unroll
        acc = lam[0] * q[h * kk:h * kk + 1, :]
        for k in range(1, kk):
            acc = acc + lam[k] * q[h * kk + k:h * kk + k + 1, :]
        head_outs.append(acc)                               # (vv, N)
    y = jnp.concatenate(head_outs, axis=0)                  # (planes, N)

    # bn2 + relu.
    out2 = jnp.maximum(y * s2_ref[...] + b2_ref[...], 0.0)

    # conv3 + bn3 + identity shortcut + relu; single full-tile store.
    out3 = jnp.dot(w3_ref[...], out2.astype(jnp.bfloat16),
                   preferred_element_type=jnp.float32)
    o_ref[0] = jnp.maximum(out3 + b3_ref[...] + x_f32, 0.0)


# ----------------------------------------------------------------------------
# Parameter preparation (done once, outside the kernel)
# ----------------------------------------------------------------------------
def prepare_params(params, H, W):
    """Fold BN into weights/biases, stack q/k/v, build the dense local-context op."""
    planes, in_planes = params["W1"].shape
    cout = params["W3"].shape[0]
    # Fused identity shortcut: valid only for stride == 1 and
    # expansion * planes == in_planes (the configuration used here).
    assert cout == in_planes, "identity shortcut requires expansion*planes == in_planes"
    assert UU == 1, "kernel assumes LambdaConv u == 1"
    N = H * W
    pad = (MM - 1) // 2

    w1 = (params["W1"] * params["s1"][:, None]).astype(jnp.bfloat16)
    wq = params["Wq"] * params["sq"][:, None]
    wk = params["Wk"]                                       # keys have no BN
    wv = params["Wv"] * params["sv"][:, None]
    wqkv = jnp.concatenate([wq, wk, wv], axis=0).astype(jnp.bfloat16)
    bqkv = jnp.concatenate([params["bq"],
                            jnp.zeros((KK * UU,), jnp.float32),
                            params["bv"]])[:, None]
    w3 = (params["W3"] * params["s3"][:, None]).astype(jnp.bfloat16)

    # Dense equivalent of the m x m local-context conv (replaces im2col):
    #   Weff^T[y_in*W + x_in, k*N + y_out*W + x_out]
    #     = emb[k, y_in - y_out + pad, x_in - x_out + pad]   (0 outside kernel)
    emb2d = params["emb"].reshape(KK, MM, MM)               # u == 1, depth 1
    dy = jnp.arange(H)[None, :] - jnp.arange(H)[:, None] + pad      # (Ho, Hi)
    dx = jnp.arange(W)[None, :] - jnp.arange(W)[:, None] + pad      # (Wo, Wi)
    valid = ((dy >= 0) & (dy < MM))[None, :, :, None, None] & \
            ((dx >= 0) & (dx < MM))[None, None, None, :, :]
    w5 = emb2d[:, jnp.clip(dy, 0, MM - 1), :][:, :, :, jnp.clip(dx, 0, MM - 1)]
    w5 = jnp.where(valid, w5, 0.0)                          # (k, Ho, Hi, Wo, Wi)
    wefft = w5.transpose(2, 4, 0, 1, 3).reshape(N, KK * N).astype(jnp.bfloat16)

    return {
        "w1": w1, "b1": params["b1"][:, None],
        "wqkv": wqkv, "bqkv": bqkv,
        "wefft": wefft,
        "s2": params["s2"][:, None], "b2": params["b2"][:, None],
        "w3": w3, "b3": params["b3"][:, None],
    }


# ----------------------------------------------------------------------------
# Forward pass: one pallas_call for the whole bottleneck
# ----------------------------------------------------------------------------
def lambda_bottleneck_forward(x, prep):
    B, cin, H, W = x.shape
    N = H * W
    planes = prep["s2"].shape[0]
    vv = planes // HEADS
    cout = prep["w3"].shape[0]

    x_b = x.reshape(B, cin, N)                              # free NCHW reshape

    def whole(arr):                                         # grid-invariant operand
        return pl.BlockSpec(arr.shape, lambda b: (0,) * arr.ndim)

    out = pl.pallas_call(
        functools.partial(_bottleneck_kernel, heads=HEADS, kk=KK, vv=vv),
        out_shape=jax.ShapeDtypeStruct((B, cout, N), jnp.float32),
        grid=(B,),
        in_specs=[
            pl.BlockSpec((1, cin, N), lambda b: (b, 0, 0)),
            whole(prep["w1"]), whole(prep["b1"]),
            whole(prep["wqkv"]), whole(prep["bqkv"]),
            whole(prep["wefft"]),
            whole(prep["s2"]), whole(prep["b2"]),
            whole(prep["w3"]), whole(prep["b3"]),
        ],
        out_specs=pl.BlockSpec((1, cout, N), lambda b: (b, 0, 0)),
        compiler_params=pltpu.CompilerParams(
            dimension_semantics=("parallel",),
            vmem_limit_bytes=32 * 1024 * 1024,
        ),
    )(x_b, prep["w1"], prep["b1"], prep["wqkv"], prep["bqkv"], prep["wefft"],
      prep["s2"], prep["b2"], prep["w3"], prep["b3"])

    return out.reshape(B, cout, H, W)


# ----------------------------------------------------------------------------
# Parameters (deterministic, synthetic)
# ----------------------------------------------------------------------------
def make_params(key, in_planes, planes):
    vv = planes // HEADS
    keys = jax.random.split(key, 11)

    def w_init(k, cout, cin):
        return (jax.random.normal(k, (cout, cin), jnp.float32) / jnp.sqrt(cin)).astype(jnp.float32)

    def bn_init(k, c):
        k1, k2, k3, k4 = jax.random.split(k, 4)
        gamma = 1.0 + 0.1 * jax.random.normal(k1, (c,), jnp.float32)
        beta = 0.1 * jax.random.normal(k2, (c,), jnp.float32)
        mean = 0.1 * jax.random.normal(k3, (c,), jnp.float32)
        var = jax.random.uniform(k4, (c,), jnp.float32, minval=0.5, maxval=1.5)
        scale = gamma / jnp.sqrt(var + 1e-5)
        shift = beta - mean * scale
        return scale, shift

    p = {}
    p["W1"] = w_init(keys[0], planes, in_planes)
    p["s1"], p["b1"] = bn_init(keys[1], planes)
    p["Wq"] = w_init(keys[2], KK * HEADS, planes)
    p["sq"], p["bq"] = bn_init(keys[3], KK * HEADS)
    p["Wk"] = w_init(keys[4], KK * UU, planes)
    p["Wv"] = w_init(keys[5], vv * UU, planes)
    p["sv"], p["bv"] = bn_init(keys[6], vv * UU)
    p["emb"] = jax.random.normal(keys[7], (KK, UU, 1, MM, MM), jnp.float32)
    p["s2"], p["b2"] = bn_init(keys[8], planes)
    p["W3"] = w_init(keys[9], 4 * planes, planes)
    p["s3"], p["b3"] = bn_init(keys[10], 4 * planes)
    return p


# ----------------------------------------------------------------------------
# Pure-JAX reference (numerical sanity check)
# ----------------------------------------------------------------------------
def reference_forward(x, params):
    B, Cin, H, W = x.shape
    N = H * W
    planes = params["W1"].shape[0]
    vv = planes // HEADS
    pad = (MM - 1) // 2
    hi = jax.lax.Precision.HIGHEST

    def conv1x1(t, w):
        return jnp.einsum("oc,bchw->bohw", w, t, precision=hi)

    def bn(t, s, b):
        return t * s[None, :, None, None] + b[None, :, None, None]

    out1 = jax.nn.relu(bn(conv1x1(x, params["W1"]), params["s1"], params["b1"]))

    q = bn(conv1x1(out1, params["Wq"]), params["sq"], params["bq"]).reshape(B, HEADS, KK, N)
    kx = conv1x1(out1, params["Wk"]).reshape(B, KK, UU, N)
    sm = jax.nn.softmax(kx, axis=-1)
    v = bn(conv1x1(out1, params["Wv"]), params["sv"], params["bv"]).reshape(B, vv, UU, N)

    lam_c = jnp.einsum("bkum,bvum->bkv", sm, v, precision=hi)
    y_c = jnp.einsum("bhkn,bkv->bhvn", q, lam_c, precision=hi)

    v_img = v.reshape(B * vv, 1, H, W)
    lam_p = jax.lax.conv_general_dilated(
        v_img, params["emb"].reshape(KK, 1, MM, MM),
        window_strides=(1, 1), padding=((pad, pad), (pad, pad)),
        dimension_numbers=("NCHW", "OIHW", "NCHW"), precision=hi)
    lam_p = lam_p.reshape(B, vv, KK, N).transpose(0, 2, 1, 3)           # (B, kk, vv, N)
    y_p = jnp.einsum("bhkn,bkvn->bhvn", q, lam_p, precision=hi)

    lam_out = (y_c + y_p).reshape(B, planes, H, W)
    out2 = jax.nn.relu(bn(lam_out, params["s2"], params["b2"]))
    out3 = bn(conv1x1(out2, params["W3"]), params["s3"], params["b3"]) + x
    return jax.nn.relu(out3)


# ----------------------------------------------------------------------------
if __name__ == "__main__":
    B, IN_PLANES, PLANES, H, W = 2, 64, 16, 8, 8   # expansion*planes == in_planes

    key = jax.random.PRNGKey(0)
    kx, kp = jax.random.split(key)
    x = jax.random.normal(kx, (B, IN_PLANES, H, W), jnp.float32)
    params = make_params(kp, IN_PLANES, PLANES)
    prep = prepare_params(params, H, W)

    out = lambda_bottleneck_forward(x, prep)
    out = jax.block_until_ready(out)
    assert out.shape == (B, 4 * PLANES, H, W), out.shape

    ref = reference_forward(x, params)
    rel_err = float(jnp.max(jnp.abs(out - ref)) / (jnp.max(jnp.abs(ref)) + 1e-6))
    # bf16 matmul operands with f32 accumulation (per perf review) -> sub-1%
    # typical deviation; 2e-2 leaves comfortable margin.
    assert rel_err < 2e-2, f"mismatch vs reference: rel_err={rel_err}"

    print("KERNEL_OK")
</pallas_src>

<mosaic_0001>
module attributes {stable_mosaic.version = 11 : i64} {
  func.func @_bottleneck_kernel(%arg0: i32, %arg1: memref<1x64x64xf32, #tpu.memory_space<vmem>>, %arg2: memref<16x64xbf16, #tpu.memory_space<vmem>>, %arg3: memref<16x1xf32, #tpu.memory_space<vmem>>, %arg4: memref<84x16xbf16, #tpu.memory_space<vmem>>, %arg5: memref<84x1xf32, #tpu.memory_space<vmem>>, %arg6: memref<64x1024xbf16, #tpu.memory_space<vmem>>, %arg7: memref<16x1xf32, #tpu.memory_space<vmem>>, %arg8: memref<16x1xf32, #tpu.memory_space<vmem>>, %arg9: memref<64x16xbf16, #tpu.memory_space<vmem>>, %arg10: memref<64x1xf32, #tpu.memory_space<vmem>>, %arg11: memref<1x64x64xf32, #tpu.memory_space<vmem>>) attributes {dimension_semantics = [#tpu.dimension_semantics<parallel>], iteration_bounds = array<i64: 2>, scalar_prefetch = 0 : i64, scratch_operands = 0 : i64, tpu.core_type = #tpu.core_type<tc>, window_params = [{transform_indices = @transform_0, window_bounds = array<i64: 1, 64, 64>}, {pipeline_mode = #tpu.pipeline_mode<synchronous>, transform_indices = @transform_1, window_bounds = array<i64: 16, 64>}, {pipeline_mode = #tpu.pipeline_mode<synchronous>, transform_indices = @transform_2, window_bounds = array<i64: 16, 1>}, {pipeline_mode = #tpu.pipeline_mode<synchronous>, transform_indices = @transform_3, window_bounds = array<i64: 84, 16>}, {pipeline_mode = #tpu.pipeline_mode<synchronous>, transform_indices = @transform_4, window_bounds = array<i64: 84, 1>}, {pipeline_mode = #tpu.pipeline_mode<synchronous>, transform_indices = @transform_5, window_bounds = array<i64: 64, 1024>}, {pipeline_mode = #tpu.pipeline_mode<synchronous>, transform_indices = @transform_6, window_bounds = array<i64: 16, 1>}, {pipeline_mode = #tpu.pipeline_mode<synchronous>, transform_indices = @transform_7, window_bounds = array<i64: 16, 1>}, {pipeline_mode = #tpu.pipeline_mode<synchronous>, transform_indices = @transform_8, window_bounds = array<i64: 64, 16>}, {pipeline_mode = #tpu.pipeline_mode<synchronous>, transform_indices = @transform_9, window_bounds = array<i64: 64, 1>}, {transform_indices = @transform_10, window_bounds = array<i64: 1, 64, 64>}]} {
    %c0 = arith.constant 0 : index
    %c0_0 = arith.constant 0 : index
    %c0_1 = arith.constant 0 : index
    %0 = vector.load %arg1[%c0, %c0_0, %c0_1] : memref<1x64x64xf32, #tpu.memory_space<vmem>>, vector<1x64x64xf32>
    %1 = vector.shape_cast %0 : vector<1x64x64xf32> to vector<64x64xf32>
    %c0_2 = arith.constant 0 : index
    %c0_3 = arith.constant 0 : index
    %2 = vector.load %arg2[%c0_2, %c0_3] : memref<16x64xbf16, #tpu.memory_space<vmem>>, vector<16x64xbf16>
    %3 = arith.truncf %1 : vector<64x64xf32> to vector<64x64xbf16>
    %cst = arith.constant dense<0.000000e+00> : vector<16x64xf32>
    %4 = tpu.matmul %2, %3, %cst {dimension_numbers = #tpu.dot_dimension_numbers<[1], [0], [0], [1], [0, 0, 1, 1], [], []>} : vector<16x64xbf16>, vector<64x64xbf16>, vector<16x64xf32> -> vector<16x64xf32>
    %c0_4 = arith.constant 0 : index
    %c0_5 = arith.constant 0 : index
    %5 = vector.load %arg3[%c0_4, %c0_5] : memref<16x1xf32, #tpu.memory_space<vmem>>, vector<16x1xf32>
    %6 = vector.broadcast %5 : vector<16x1xf32> to vector<16x64xf32>
    %7 = arith.addf %4, %6 : vector<16x64xf32>
    %cst_6 = arith.constant 0.000000e+00 : f32
    %8 = vector.broadcast %cst_6 : f32 to vector<16x64xf32>
    %9 = arith.maximumf %7, %8 : vector<16x64xf32>
    %c0_7 = arith.constant 0 : index
    %c0_8 = arith.constant 0 : index
    %10 = vector.load %arg4[%c0_7, %c0_8] : memref<84x16xbf16, #tpu.memory_space<vmem>>, vector<84x16xbf16>
    %11 = arith.truncf %9 : vector<16x64xf32> to vector<16x64xbf16>
    %cst_9 = arith.constant dense<0.000000e+00> : vector<84x64xf32>
    %12 = tpu.matmul %10, %11, %cst_9 {dimension_numbers = #tpu.dot_dimension_numbers<[1], [0], [0], [1], [0, 0, 1, 1], [], []>} : vector<84x16xbf16>, vector<16x64xbf16>, vector<84x64xf32> -> vector<84x64xf32>
    %c0_10 = arith.constant 0 : index
    %c0_11 = arith.constant 0 : index
    %13 = vector.load %arg5[%c0_10, %c0_11] : memref<84x1xf32, #tpu.memory_space<vmem>>, vector<84x1xf32>
    %14 = vector.broadcast %13 : vector<84x1xf32> to vector<84x64xf32>
    %15 = arith.addf %12, %14 : vector<84x64xf32>
    %16 = vector.extract_strided_slice %15 {offsets = [0, 0], sizes = [64, 64], strides = [1, 1]} : vector<84x64xf32> to vector<64x64xf32>
    %17 = vector.extract_strided_slice %15 {offsets = [64, 0], sizes = [16, 64], strides = [1, 1]} : vector<84x64xf32> to vector<16x64xf32>
    %18 = vector.extract_strided_slice %15 {offsets = [80, 0], sizes = [4, 64], strides = [1, 1]} : vector<84x64xf32> to vector<4x64xf32>
    %cst_12 = arith.constant dense<0xFF800000> : vector<16xf32>
    %19 = vector.multi_reduction <maximumf>, %17, %cst_12 [1] : vector<16x64xf32> to vector<16xf32>
    %20 = vector.shape_cast %19 : vector<16xf32> to vector<16x1xf32>
    %21 = vector.broadcast %20 : vector<16x1xf32> to vector<16x64xf32>
    %22 = arith.subf %17, %21 : vector<16x64xf32>
    %23 = math.exp %22 : vector<16x64xf32>
    %cst_13 = arith.constant dense<0.000000e+00> : vector<16xf32>
    %24 = vector.multi_reduction <add>, %23, %cst_13 [1] : vector<16x64xf32> to vector<16xf32>
    %25 = vector.shape_cast %24 : vector<16xf32> to vector<16x1xf32>
    %26 = tpu.reciprocal %25 {approx = true} : vector<16x1xf32> -> vector<16x1xf32>
    %27 = vector.broadcast %26 : vector<16x1xf32> to vector<16x64xf32>
    %28 = arith.mulf %23, %27 : vector<16x64xf32>
    %cst_14 = arith.constant dense<0.000000e+00> : vector<4x16xf32>
    %29 = tpu.matmul %18, %28, %cst_14 {dimension_numbers = #tpu.dot_dimension_numbers<[1], [1], [0], [0], [0, 0, 1, 0], [], []>} : vector<4x64xf32>, vector<16x64xf32>, vector<4x16xf32> -> vector<4x16xf32>
    %30 = arith.truncf %18 : vector<4x64xf32> to vector<4x64xbf16>
    %c0_15 = arith.constant 0 : index
    %c0_16 = arith.constant 0 : index
    %31 = vector.load %arg6[%c0_15, %c0_16] : memref<64x1024xbf16, #tpu.memory_space<vmem>>, vector<64x1024xbf16>
    %cst_17 = arith.constant dense<0.000000e+00> : vector<4x1024xf32>
    %32 = tpu.matmul %30, %31, %cst_17 {dimension_numbers = #tpu.dot_dimension_numbers<[1], [0], [0], [1], [0, 0, 1, 1], [], []>} : vector<4x64xbf16>, vector<64x1024xbf16>, vector<4x1024xf32> -> vector<4x1024xf32>
    %33 = vector.extract_strided_slice %32 {offsets = [0, 0], sizes = [4, 64], strides = [1, 1]} : vector<4x1024xf32> to vector<4x64xf32>
    %34 = vector.extract_strided_slice %29 {offsets = [0, 0], sizes = [4, 1], strides = [1, 1]} : vector<4x16xf32> to vector<4x1xf32>
    %35 = vector.broadcast %34 : vector<4x1xf32> to vector<4x64xf32>
    %36 = arith.addf %33, %35 : vector<4x64xf32>
    %37 = vector.extract_strided_slice %32 {offsets = [0, 64], sizes = [4, 64], strides = [1, 1]} : vector<4x1024xf32> to vector<4x64xf32>
    %38 = vector.extract_strided_slice %29 {offsets = [0, 1], sizes = [4, 1], strides = [1, 1]} : vector<4x16xf32> to vector<4x1xf32>
    %39 = vector.broadcast %38 : vector<4x1xf32> to vector<4x64xf32>
    %40 = arith.addf %37, %39 : vector<4x64xf32>
    %41 = vector.extract_strided_slice %32 {offsets = [0, 128], sizes = [4, 64], strides = [1, 1]} : vector<4x1024xf32> to vector<4x64xf32>
    %42 = vector.extract_strided_slice %29 {offsets = [0, 2], sizes = [4, 1], strides = [1, 1]} : vector<4x16xf32> to vector<4x1xf32>
    %43 = vector.broadcast %42 : vector<4x1xf32> to vector<4x64xf32>
    %44 = arith.addf %41, %43 : vector<4x64xf32>
    %45 = vector.extract_strided_slice %32 {offsets = [0, 192], sizes = [4, 64], strides = [1, 1]} : vector<4x1024xf32> to vector<4x64xf32>
    %46 = vector.extract_strided_slice %29 {offsets = [0, 3], sizes = [4, 1], strides = [1, 1]} : vector<4x16xf32> to vector<4x1xf32>
    %47 = vector.broadcast %46 : vector<4x1xf32> to vector<4x64xf32>
    %48 = arith.addf %45, %47 : vector<4x64xf32>
    %49 = vector.extract_strided_slice %32 {offsets = [0, 256], sizes = [4, 64], strides = [1, 1]} : vector<4x1024xf32> to vector<4x64xf32>
    %50 = vector.extract_strided_slice %29 {offsets = [0, 4], sizes = [4, 1], strides = [1, 1]} : vector<4x16xf32> to vector<4x1xf32>
    %51 = vector.broadcast %50 : vector<4x1xf32> to vector<4x64xf32>
    %52 = arith.addf %49, %51 : vector<4x64xf32>
    %53 = vector.extract_strided_slice %32 {offsets = [0, 320], sizes = [4, 64], strides = [1, 1]} : vector<4x1024xf32> to vector<4x64xf32>
    %54 = vector.extract_strided_slice %29 {offsets = [0, 5], sizes = [4, 1], strides = [1, 1]} : vector<4x16xf32> to vector<4x1xf32>
    %55 = vector.broadcast %54 : vector<4x1xf32> to vector<4x64xf32>
    %56 = arith.addf %53, %55 : vector<4x64xf32>
    %57 = vector.extract_strided_slice %32 {offsets = [0, 384], sizes = [4, 64], strides = [1, 1]} : vector<4x1024xf32> to vector<4x64xf32>
    %58 = vector.extract_strided_slice %29 {offsets = [0, 6], sizes = [4, 1], strides = [1, 1]} : vector<4x16xf32> to vector<4x1xf32>
    %59 = vector.broadcast %58 : vector<4x1xf32> to vector<4x64xf32>
    %60 = arith.addf %57, %59 : vector<4x64xf32>
    %61 = vector.extract_strided_slice %32 {offsets = [0, 448], sizes = [4, 64], strides = [1, 1]} : vector<4x1024xf32> to vector<4x64xf32>
    %62 = vector.extract_strided_slice %29 {offsets = [0, 7], sizes = [4, 1], strides = [1, 1]} : vector<4x16xf32> to vector<4x1xf32>
    %63 = vector.broadcast %62 : vector<4x1xf32> to vector<4x64xf32>
    %64 = arith.addf %61, %63 : vector<4x64xf32>
    %65 = vector.extract_strided_slice %32 {offsets = [0, 512], sizes = [4, 64], strides = [1, 1]} : vector<4x1024xf32> to vector<4x64xf32>
    %66 = vector.extract_strided_slice %29 {offsets = [0, 8], sizes = [4, 1], strides = [1, 1]} : vector<4x16xf32> to vector<4x1xf32>
    %67 = vector.broadcast %66 : vector<4x1xf32> to vector<4x64xf32>
    %68 = arith.addf %65, %67 : vector<4x64xf32>
    %69 = vector.extract_strided_slice %32 {offsets = [0, 576], sizes = [4, 64], strides = [1, 1]} : vector<4x1024xf32> to vector<4x64xf32>
    %70 = vector.extract_strided_slice %29 {offsets = [0, 9], sizes = [4, 1], strides = [1, 1]} : vector<4x16xf32> to vector<4x1xf32>
    %71 = vector.broadcast %70 : vector<4x1xf32> to vector<4x64xf32>
    %72 = arith.addf %69, %71 : vector<4x64xf32>
    %73 = vector.extract_strided_slice %32 {offsets = [0, 640], sizes = [4, 64], strides = [1, 1]} : vector<4x1024xf32> to vector<4x64xf32>
    %74 = vector.extract_strided_slice %29 {offsets = [0, 10], sizes = [4, 1], strides = [1, 1]} : vector<4x16xf32> to vector<4x1xf32>
    %75 = vector.broadcast %74 : vector<4x1xf32> to vector<4x64xf32>
    %76 = arith.addf %73, %75 : vector<4x64xf32>
    %77 = vector.extract_strided_slice %32 {offsets = [0, 704], sizes = [4, 64], strides = [1, 1]} : vector<4x1024xf32> to vector<4x64xf32>
    %78 = vector.extract_strided_slice %29 {offsets = [0, 11], sizes = [4, 1], strides = [1, 1]} : vector<4x16xf32> to vector<4x1xf32>
    %79 = vector.broadcast %78 : vector<4x1xf32> to vector<4x64xf32>
    %80 = arith.addf %77, %79 : vector<4x64xf32>
    %81 = vector.extract_strided_slice %32 {offsets = [0, 768], sizes = [4, 64], strides = [1, 1]} : vector<4x1024xf32> to vector<4x64xf32>
    %82 = vector.extract_strided_slice %29 {offsets = [0, 12], sizes = [4, 1], strides = [1, 1]} : vector<4x16xf32> to vector<4x1xf32>
    %83 = vector.broadcast %82 : vector<4x1xf32> to vector<4x64xf32>
    %84 = arith.addf %81, %83 : vector<4x64xf32>
    %85 = vector.extract_strided_slice %32 {offsets = [0, 832], sizes = [4, 64], strides = [1, 1]} : vector<4x1024xf32> to vector<4x64xf32>
    %86 = vector.extract_strided_slice %29 {offsets = [0, 13], sizes = [4, 1], strides = [1, 1]} : vector<4x16xf32> to vector<4x1xf32>
    %87 = vector.broadcast %86 : vector<4x1xf32> to vector<4x64xf32>
    %88 = arith.addf %85, %87 : vector<4x64xf32>
    %89 = vector.extract_strided_slice %32 {offsets = [0, 896], sizes = [4, 64], strides = [1, 1]} : vector<4x1024xf32> to vector<4x64xf32>
    %90 = vector.extract_strided_slice %29 {offsets = [0, 14], sizes = [4, 1], strides = [1, 1]} : vector<4x16xf32> to vector<4x1xf32>
    %91 = vector.broadcast %90 : vector<4x1xf32> to vector<4x64xf32>
    %92 = arith.addf %89, %91 : vector<4x64xf32>
    %93 = vector.extract_strided_slice %32 {offsets = [0, 960], sizes = [4, 64], strides = [1, 1]} : vector<4x1024xf32> to vector<4x64xf32>
    %94 = vector.extract_strided_slice %29 {offsets = [0, 15], sizes = [4, 1], strides = [1, 1]} : vector<4x16xf32> to vector<4x1xf32>
    %95 = vector.broadcast %94 : vector<4x1xf32> to vector<4x64xf32>
    %96 = arith.addf %93, %95 : vector<4x64xf32>
    %97 = vector.extract_strided_slice %16 {offsets = [0, 0], sizes = [1, 64], strides = [1, 1]} : vector<64x64xf32> to vector<1x64xf32>
    %98 = vector.broadcast %97 : vector<1x64xf32> to vector<4x64xf32>
    %99 = arith.mulf %36, %98 : vector<4x64xf32>
    %100 = vector.extract_strided_slice %16 {offsets = [1, 0], sizes = [1, 64], strides = [1, 1]} : vector<64x64xf32> to vector<1x64xf32>
    %101 = vector.broadcast %100 : vector<1x64xf32> to vector<4x64xf32>
    %102 = arith.mulf %40, %101 : vector<4x64xf32>
    %103 = arith.addf %99, %102 : vector<4x64xf32>
    %104 = vector.extract_strided_slice %16 {offsets = [2, 0], sizes = [1, 64], strides = [1, 1]} : vector<64x64xf32> to vector<1x64xf32>
    %105 = vector.broadcast %104 : vector<1x64xf32> to vector<4x64xf32>
    %106 = arith.mulf %44, %105 : vector<4x64xf32>
    %107 = arith.addf %103, %106 : vector<4x64xf32>
    %108 = vector.extract_strided_slice %16 {offsets = [3, 0], sizes = [1, 64], strides = [1, 1]} : vector<64x64xf32> to vector<1x64xf32>
    %109 = vector.broadcast %108 : vector<1x64xf32> to vector<4x64xf32>
    %110 = arith.mulf %48, %109 : vector<4x64xf32>
    %111 = arith.addf %107, %110 : vector<4x64xf32>
    %112 = vector.extract_strided_slice %16 {offsets = [4, 0], sizes = [1, 64], strides = [1, 1]} : vector<64x64xf32> to vector<1x64xf32>
    %113 = vector.broadcast %112 : vector<1x64xf32> to vector<4x64xf32>
    %114 = arith.mulf %52, %113 : vector<4x64xf32>
    %115 = arith.addf %111, %114 : vector<4x64xf32>
    %116 = vector.extract_strided_slice %16 {offsets = [5, 0], sizes = [1, 64], strides = [1, 1]} : vector<64x64xf32> to vector<1x64xf32>
    %117 = vector.broadcast %116 : vector<1x64xf32> to vector<4x64xf32>
    %118 = arith.mulf %56, %117 : vector<4x64xf32>
    %119 = arith.addf %115, %118 : vector<4x64xf32>
    %120 = vector.extract_strided_slice %16 {offsets = [6, 0], sizes = [1, 64], strides = [1, 1]} : vector<64x64xf32> to vector<1x64xf32>
    %121 = vector.broadcast %120 : vector<1x64xf32> to vector<4x64xf32>
    %122 = arith.mulf %60, %121 : vector<4x64xf32>
    %123 = arith.addf %119, %122 : vector<4x64xf32>
    %124 = vector.extract_strided_slice %16 {offsets = [7, 0], sizes = [1, 64], strides = [1, 1]} : vector<64x64xf32> to vector<1x64xf32>
    %125 = vector.broadcast %124 : vector<1x64xf32> to vector<4x64xf32>
    %126 = arith.mulf %64, %125 : vector<4x64xf32>
    %127 = arith.addf %123, %126 : vector<4x64xf32>
    %128 = vector.extract_strided_slice %16 {offsets = [8, 0], sizes = [1, 64], strides = [1, 1]} : vector<64x64xf32> to vector<1x64xf32>
    %129 = vector.broadcast %128 : vector<1x64xf32> to vector<4x64xf32>
    %130 = arith.mulf %68, %129 : vector<4x64xf32>
    %131 = arith.addf %127, %130 : vector<4x64xf32>
    %132 = vector.extract_strided_slice %16 {offsets = [9, 0], sizes = [1, 64], strides = [1, 1]} : vector<64x64xf32> to vector<1x64xf32>
    %133 = vector.broadcast %132 : vector<1x64xf32> to vector<4x64xf32>
    %134 = arith.mulf %72, %133 : vector<4x64xf32>
    %135 = arith.addf %131, %134 : vector<4x64xf32>
    %136 = vector.extract_strided_slice %16 {offsets = [10, 0], sizes = [1, 64], strides = [1, 1]} : vector<64x64xf32> to vector<1x64xf32>
    %137 = vector.broadcast %136 : vector<1x64xf32> to vector<4x64xf32>
    %138 = arith.mulf %76, %137 : vector<4x64xf32>
    %139 = arith.addf %135, %138 : vector<4x64xf32>
    %140 = vector.extract_strided_slice %16 {offsets = [11, 0], sizes = [1, 64], strides = [1, 1]} : vector<64x64xf32> to vector<1x64xf32>
    %141 = vector.broadcast %140 : vector<1x64xf32> to vector<4x64xf32>
    %142 = arith.mulf %80, %141 : vector<4x64xf32>
    %143 = arith.addf %139, %142 : vector<4x64xf32>
    %144 = vector.extract_strided_slice %16 {offsets = [12, 0], sizes = [1, 64], strides = [1, 1]} : vector<64x64xf32> to vector<1x64xf32>
    %145 = vector.broadcast %144 : vector<1x64xf32> to vector<4x64xf32>
    %146 = arith.mulf %84, %145 : vector<4x64xf32>
    %147 = arith.addf %143, %146 : vector<4x64xf32>
    %148 = vector.extract_strided_slice %16 {offsets = [13, 0], sizes = [1, 64], strides = [1, 1]} : vector<64x64xf32> to vector<1x64xf32>
    %149 = vector.broadcast %148 : vector<1x64xf32> to vector<4x64xf32>
    %150 = arith.mulf %88, %149 : vector<4x64xf32>
    %151 = arith.addf %147, %150 : vector<4x64xf32>
    %152 = vector.extract_strided_slice %16 {offsets = [14, 0], sizes = [1, 64], strides = [1, 1]} : vector<64x64xf32> to vector<1x64xf32>
    %153 = vector.broadcast %152 : vector<1x64xf32> to vector<4x64xf32>
    %154 = arith.mulf %92, %153 : vector<4x64xf32>
    %155 = arith.addf %151, %154 : vector<4x64xf32>
    %156 = vector.extract_strided_slice %16 {offsets = [15, 0], sizes = [1, 64], strides = [1, 1]} : vector<64x64xf32> to vector<1x64xf32>
    %157 = vector.broadcast %156 : vector<1x64xf32> to vector<4x64xf32>
    %158 = arith.mulf %96, %157 : vector<4x64xf32>
    %159 = arith.addf %155, %158 : vector<4x64xf32>
    %160 = vector.extract_strided_slice %16 {offsets = [16, 0], sizes = [1, 64], strides = [1, 1]} : vector<64x64xf32> to vector<1x64xf32>
    %161 = vector.broadcast %160 : vector<1x64xf32> to vector<4x64xf32>
    %162 = arith.mulf %36, %161 : vector<4x64xf32>
    %163 = vector.extract_strided_slice %16 {offsets = [17, 0], sizes = [1, 64], strides = [1, 1]} : vector<64x64xf32> to vector<1x64xf32>
    %164 = vector.broadcast %163 : vector<1x64xf32> to vector<4x64xf32>
    %165 = arith.mulf %40, %164 : vector<4x64xf32>
    %166 = arith.addf %162, %165 : vector<4x64xf32>
    %167 = vector.extract_strided_slice %16 {offsets = [18, 0], sizes = [1, 64], strides = [1, 1]} : vector<64x64xf32> to vector<1x64xf32>
    %168 = vector.broadcast %167 : vector<1x64xf32> to vector<4x64xf32>
    %169 = arith.mulf %44, %168 : vector<4x64xf32>
    %170 = arith.addf %166, %169 : vector<4x64xf32>
    %171 = vector.extract_strided_slice %16 {offsets = [19, 0], sizes = [1, 64], strides = [1, 1]} : vector<64x64xf32> to vector<1x64xf32>
    %172 = vector.broadcast %171 : vector<1x64xf32> to vector<4x64xf32>
    %173 = arith.mulf %48, %172 : vector<4x64xf32>
    %174 = arith.addf %170, %173 : vector<4x64xf32>
    %175 = vector.extract_strided_slice %16 {offsets = [20, 0], sizes = [1, 64], strides = [1, 1]} : vector<64x64xf32> to vector<1x64xf32>
    %176 = vector.broadcast %175 : vector<1x64xf32> to vector<4x64xf32>
    %177 = arith.mulf %52, %176 : vector<4x64xf32>
    %178 = arith.addf %174, %177 : vector<4x64xf32>
    %179 = vector.extract_strided_slice %16 {offsets = [21, 0], sizes = [1, 64], strides = [1, 1]} : vector<64x64xf32> to vector<1x64xf32>
    %180 = vector.broadcast %179 : vector<1x64xf32> to vector<4x64xf32>
    %181 = arith.mulf %56, %180 : vector<4x64xf32>
    %182 = arith.addf %178, %181 : vector<4x64xf32>
    %183 = vector.extract_strided_slice %16 {offsets = [22, 0], sizes = [1, 64], strides = [1, 1]} : vector<64x64xf32> to vector<1x64xf32>
    %184 = vector.broadcast %183 : vector<1x64xf32> to vector<4x64xf32>
    %185 = arith.mulf %60, %184 : vector<4x64xf32>
    %186 = arith.addf %182, %185 : vector<4x64xf32>
    %187 = vector.extract_strided_slice %16 {offsets = [23, 0], sizes = [1, 64], strides = [1, 1]} : vector<64x64xf32> to vector<1x64xf32>
    %188 = vector.broadcast %187 : vector<1x64xf32> to vector<4x64xf32>
    %189 = arith.mulf %64, %188 : vector<4x64xf32>
    %190 = arith.addf %186, %189 : vector<4x64xf32>
    %191 = vector.extract_strided_slice %16 {offsets = [24, 0], sizes = [1, 64], strides = [1, 1]} : vector<64x64xf32> to vector<1x64xf32>
    %192 = vector.broadcast %191 : vector<1x64xf32> to vector<4x64xf32>
    %193 = arith.mulf %68, %192 : vector<4x64xf32>
    %194 = arith.addf %190, %193 : vector<4x64xf32>
    %195 = vector.extract_strided_slice %16 {offsets = [25, 0], sizes = [1, 64], strides = [1, 1]} : vector<64x64xf32> to vector<1x64xf32>
    %196 = vector.broadcast %195 : vector<1x64xf32> to vector<4x64xf32>
    %197 = arith.mulf %72, %196 : vector<4x64xf32>
    %198 = arith.addf %194, %197 : vector<4x64xf32>
    %199 = vector.extract_strided_slice %16 {offsets = [26, 0], sizes = [1, 64], strides = [1, 1]} : vector<64x64xf32> to vector<1x64xf32>
    %200 = vector.broadcast %199 : vector<1x64xf32> to vector<4x64xf32>
    %201 = arith.mulf %76, %200 : vector<4x64xf32>
    %202 = arith.addf %198, %201 : vector<4x64xf32>
    %203 = vector.extract_strided_slice %16 {offsets = [27, 0], sizes = [1, 64], strides = [1, 1]} : vector<64x64xf32> to vector<1x64xf32>
    %204 = vector.broadcast %203 : vector<1x64xf32> to vector<4x64xf32>
    %205 = arith.mulf %80, %204 : vector<4x64xf32>
    %206 = arith.addf %202, %205 : vector<4x64xf32>
    %207 = vector.extract_strided_slice %16 {offsets = [28, 0], sizes = [1, 64], strides = [1, 1]} : vector<64x64xf32> to vector<1x64xf32>
    %208 = vector.broadcast %207 : vector<1x64xf32> to vector<4x64xf32>
    %209 = arith.mulf %84, %208 : vector<4x64xf32>
    %210 = arith.addf %206, %209 : vector<4x64xf32>
    %211 = vector.extract_strided_slice %16 {offsets = [29, 0], sizes = [1, 64], strides = [1, 1]} : vector<64x64xf32> to vector<1x64xf32>
    %212 = vector.broadcast %211 : vector<1x64xf32> to vector<4x64xf32>
    %213 = arith.mulf %88, %212 : vector<4x64xf32>
    %214 = arith.addf %210, %213 : vector<4x64xf32>
    %215 = vector.extract_strided_slice %16 {offsets = [30, 0], sizes = [1, 64], strides = [1, 1]} : vector<64x64xf32> to vector<1x64xf32>
    %216 = vector.broadcast %215 : vector<1x64xf32> to vector<4x64xf32>
    %217 = arith.mulf %92, %216 : vector<4x64xf32>
    %218 = arith.addf %214, %217 : vector<4x64xf32>
    %219 = vector.extract_strided_slice %16 {offsets = [31, 0], sizes = [1, 64], strides = [1, 1]} : vector<64x64xf32> to vector<1x64xf32>
    %220 = vector.broadcast %219 : vector<1x64xf32> to vector<4x64xf32>
    %221 = arith.mulf %96, %220 : vector<4x64xf32>
    %222 = arith.addf %218, %221 : vector<4x64xf32>
    %223 = vector.extract_strided_slice %16 {offsets = [32, 0], sizes = [1, 64], strides = [1, 1]} : vector<64x64xf32> to vector<1x64xf32>
    %224 = vector.broadcast %223 : vector<1x64xf32> to vector<4x64xf32>
    %225 = arith.mulf %36, %224 : vector<4x64xf32>
    %226 = vector.extract_strided_slice %16 {offsets = [33, 0], sizes = [1, 64], strides = [1, 1]} : vector<64x64xf32> to vector<1x64xf32>
    %227 = vector.broadcast %226 : vector<1x64xf32> to vector<4x64xf32>
    %228 = arith.mulf %40, %227 : vector<4x64xf32>
    %229 = arith.addf %225, %228 : vector<4x64xf32>
    %230 = vector.extract_strided_slice %16 {offsets = [34, 0], sizes = [1, 64], strides = [1, 1]} : vector<64x64xf32> to vector<1x64xf32>
    %231 = vector.broadcast %230 : vector<1x64xf32> to vector<4x64xf32>
    %232 = arith.mulf %44, %231 : vector<4x64xf32>
    %233 = arith.addf %229, %232 : vector<4x64xf32>
    %234 = vector.extract_strided_slice %16 {offsets = [35, 0], sizes = [1, 64], strides = [1, 1]} : vector<64x64xf32> to vector<1x64xf32>
    %235 = vector.broadcast %234 : vector<1x64xf32> to vector<4x64xf32>
    %236 = arith.mulf %48, %235 : vector<4x64xf32>
    %237 = arith.addf %233, %236 : vector<4x64xf32>
    %238 = vector.extract_strided_slice %16 {offsets = [36, 0], sizes = [1, 64], strides = [1, 1]} : vector<64x64xf32> to vector<1x64xf32>
    %239 = vector.broadcast %238 : vector<1x64xf32> to vector<4x64xf32>
    %240 = arith.mulf %52, %239 : vector<4x64xf32>
    %241 = arith.addf %237, %240 : vector<4x64xf32>
    %242 = vector.extract_strided_slice %16 {offsets = [37, 0], sizes = [1, 64], strides = [1, 1]} : vector<64x64xf32> to vector<1x64xf32>
    %243 = vector.broadcast %242 : vector<1x64xf32> to vector<4x64xf32>
    %244 = arith.mulf %56, %243 : vector<4x64xf32>
    %245 = arith.addf %241, %244 : vector<4x64xf32>
    %246 = vector.extract_strided_slice %16 {offsets = [38, 0], sizes = [1, 64], strides = [1, 1]} : vector<64x64xf32> to vector<1x64xf32>
    %247 = vector.broadcast %246 : vector<1x64xf32> to vector<4x64xf32>
    %248 = arith.mulf %60, %247 : vector<4x64xf32>
    %249 = arith.addf %245, %248 : vector<4x64xf32>
    %250 = vector.extract_strided_slice %16 {offsets = [39, 0], sizes = [1, 64], strides = [1, 1]} : vector<64x64xf32> to vector<1x64xf32>
    %251 = vector.broadcast %250 : vector<1x64xf32> to vector<4x64xf32>
    %252 = arith.mulf %64, %251 : vector<4x64xf32>
    %253 = arith.addf %249, %252 : vector<4x64xf32>
    %254 = vector.extract_strided_slice %16 {offsets = [40, 0], sizes = [1, 64], strides = [1, 1]} : vector<64x64xf32> to vector<1x64xf32>
    %255 = vector.broadcast %254 : vector<1x64xf32> to vector<4x64xf32>
    %256 = arith.mulf %68, %255 : vector<4x64xf32>
    %257 = arith.addf %253, %256 : vector<4x64xf32>
    %258 = vector.extract_strided_slice %16 {offsets = [41, 0], sizes = [1, 64], strides = [1, 1]} : vector<64x64xf32> to vector<1x64xf32>
    %259 = vector.broadcast %258 : vector<1x64xf32> to vector<4x64xf32>
    %260 = arith.mulf %72, %259 : vector<4x64xf32>
    %261 = arith.addf %257, %260 : vector<4x64xf32>
    %262 = vector.extract_strided_slice %16 {offsets = [42, 0], sizes = [1, 64], strides = [1, 1]} : vector<64x64xf32> to vector<1x64xf32>
    %263 = vector.broadcast %262 : vector<1x64xf32> to vector<4x64xf32>
    %264 = arith.mulf %76, %263 : vector<4x64xf32>
    %265 = arith.addf %261, %264 : vector<4x64xf32>
    %266 = vector.extract_strided_slice %16 {offsets = [43, 0], sizes = [1, 64], strides = [1, 1]} : vector<64x64xf32> to vector<1x64xf32>
    %267 = vector.broadcast %266 : vector<1x64xf32> to vector<4x64xf32>
    %268 = arith.mulf %80, %267 : vector<4x64xf32>
    %269 = arith.addf %265, %268 : vector<4x64xf32>
    %270 = vector.extract_strided_slice %16 {offsets = [44, 0], sizes = [1, 64], strides = [1, 1]} : vector<64x64xf32> to vector<1x64xf32>
    %271 = vector.broadcast %270 : vector<1x64xf32> to vector<4x64xf32>
    %272 = arith.mulf %84, %271 : vector<4x64xf32>
    %273 = arith.addf %269, %272 : vector<4x64xf32>
    %274 = vector.extract_strided_slice %16 {offsets = [45, 0], sizes = [1, 64], strides = [1, 1]} : vector<64x64xf32> to vector<1x64xf32>
    %275 = vector.broadcast %274 : vector<1x64xf32> to vector<4x64xf32>
    %276 = arith.mulf %88, %275 : vector<4x64xf32>
    %277 = arith.addf %273, %276 : vector<4x64xf32>
    %278 = vector.extract_strided_slice %16 {offsets = [46, 0], sizes = [1, 64], strides = [1, 1]} : vector<64x64xf32> to vector<1x64xf32>
    %279 = vector.broadcast %278 : vector<1x64xf32> to vector<4x64xf32>
    %280 = arith.mulf %92, %279 : vector<4x64xf32>
    %281 = arith.addf %277, %280 : vector<4x64xf32>
    %282 = vector.extract_strided_slice %16 {offsets = [47, 0], sizes = [1, 64], strides = [1, 1]} : vector<64x64xf32> to vector<1x64xf32>
    %283 = vector.broadcast %282 : vector<1x64xf32> to vector<4x64xf32>
    %284 = arith.mulf %96, %283 : vector<4x64xf32>
    %285 = arith.addf %281, %284 : vector<4x64xf32>
    %286 = vector.extract_strided_slice %16 {offsets = [48, 0], sizes = [1, 64], strides = [1, 1]} : vector<64x64xf32> to vector<1x64xf32>
    %287 = vector.broadcast %286 : vector<1x64xf32> to vector<4x64xf32>
    %288 = arith.mulf %36, %287 : vector<4x64xf32>
    %289 = vector.extract_strided_slice %16 {offsets = [49, 0], sizes = [1, 64], strides = [1, 1]} : vector<64x64xf32> to vector<1x64xf32>
    %290 = vector.broadcast %289 : vector<1x64xf32> to vector<4x64xf32>
    %291 = arith.mulf %40, %290 : vector<4x64xf32>
    %292 = arith.addf %288, %291 : vector<4x64xf32>
    %293 = vector.extract_strided_slice %16 {offsets = [50, 0], sizes = [1, 64], strides = [1, 1]} : vector<64x64xf32> to vector<1x64xf32>
    %294 = vector.broadcast %293 : vector<1x64xf32> to vector<4x64xf32>
    %295 = arith.mulf %44, %294 : vector<4x64xf32>
    %296 = arith.addf %292, %295 : vector<4x64xf32>
    %297 = vector.extract_strided_slice %16 {offsets = [51, 0], sizes = [1, 64], strides = [1, 1]} : vector<64x64xf32> to vector<1x64xf32>
    %298 = vector.broadcast %297 : vector<1x64xf32> to vector<4x64xf32>
    %299 = arith.mulf %48, %298 : vector<4x64xf32>
    %300 = arith.addf %296, %299 : vector<4x64xf32>
    %301 = vector.extract_strided_slice %16 {offsets = [52, 0], sizes = [1, 64], strides = [1, 1]} : vector<64x64xf32> to vector<1x64xf32>
    %302 = vector.broadcast %301 : vector<1x64xf32> to vector<4x64xf32>
    %303 = arith.mulf %52, %302 : vector<4x64xf32>
    %304 = arith.addf %300, %303 : vector<4x64xf32>
    %305 = vector.extract_strided_slice %16 {offsets = [53, 0], sizes = [1, 64], strides = [1, 1]} : vector<64x64xf32> to vector<1x64xf32>
    %306 = vector.broadcast %305 : vector<1x64xf32> to vector<4x64xf32>
    %307 = arith.mulf %56, %306 : vector<4x64xf32>
    %308 = arith.addf %304, %307 : vector<4x64xf32>
    %309 = vector.extract_strided_slice %16 {offsets = [54, 0], sizes = [1, 64], strides = [1, 1]} : vector<64x64xf32> to vector<1x64xf32>
    %310 = vector.broadcast %309 : vector<1x64xf32> to vector<4x64xf32>
    %311 = arith.mulf %60, %310 : vector<4x64xf32>
    %312 = arith.addf %308, %311 : vector<4x64xf32>
    %313 = vector.extract_strided_slice %16 {offsets = [55, 0], sizes = [1, 64], strides = [1, 1]} : vector<64x64xf32> to vector<1x64xf32>
    %314 = vector.broadcast %313 : vector<1x64xf32> to vector<4x64xf32>
    %315 = arith.mulf %64, %314 : vector<4x64xf32>
    %316 = arith.addf %312, %315 : vector<4x64xf32>
    %317 = vector.extract_strided_slice %16 {offsets = [56, 0], sizes = [1, 64], strides = [1, 1]} : vector<64x64xf32> to vector<1x64xf32>
    %318 = vector.broadcast %317 : vector<1x64xf32> to vector<4x64xf32>
    %319 = arith.mulf %68, %318 : vector<4x64xf32>
    %320 = arith.addf %316, %319 : vector<4x64xf32>
    %321 = vector.extract_strided_slice %16 {offsets = [57, 0], sizes = [1, 64], strides = [1, 1]} : vector<64x64xf32> to vector<1x64xf32>
    %322 = vector.broadcast %321 : vector<1x64xf32> to vector<4x64xf32>
    %323 = arith.mulf %72, %322 : vector<4x64xf32>
    %324 = arith.addf %320, %323 : vector<4x64xf32>
    %325 = vector.extract_strided_slice %16 {offsets = [58, 0], sizes = [1, 64], strides = [1, 1]} : vector<64x64xf32> to vector<1x64xf32>
    %326 = vector.broadcast %325 : vector<1x64xf32> to vector<4x64xf32>
    %327 = arith.mulf %76, %326 : vector<4x64xf32>
    %328 = arith.addf %324, %327 : vector<4x64xf32>
    %329 = vector.extract_strided_slice %16 {offsets = [59, 0], sizes = [1, 64], strides = [1, 1]} : vector<64x64xf32> to vector<1x64xf32>
    %330 = vector.broadcast %329 : vector<1x64xf32> to vector<4x64xf32>
    %331 = arith.mulf %80, %330 : vector<4x64xf32>
    %332 = arith.addf %328, %331 : vector<4x64xf32>
    %333 = vector.extract_strided_slice %16 {offsets = [60, 0], sizes = [1, 64], strides = [1, 1]} : vector<64x64xf32> to vector<1x64xf32>
    %334 = vector.broadcast %333 : vector<1x64xf32> to vector<4x64xf32>
    %335 = arith.mulf %84, %334 : vector<4x64xf32>
    %336 = arith.addf %332, %335 : vector<4x64xf32>
    %337 = vector.extract_strided_slice %16 {offsets = [61, 0], sizes = [1, 64], strides = [1, 1]} : vector<64x64xf32> to vector<1x64xf32>
    %338 = vector.broadcast %337 : vector<1x64xf32> to vector<4x64xf32>
    %339 = arith.mulf %88, %338 : vector<4x64xf32>
    %340 = arith.addf %336, %339 : vector<4x64xf32>
    %341 = vector.extract_strided_slice %16 {offsets = [62, 0], sizes = [1, 64], strides = [1, 1]} : vector<64x64xf32> to vector<1x64xf32>
    %342 = vector.broadcast %341 : vector<1x64xf32> to vector<4x64xf32>
    %343 = arith.mulf %92, %342 : vector<4x64xf32>
    %344 = arith.addf %340, %343 : vector<4x64xf32>
    %345 = vector.extract_strided_slice %16 {offsets = [63, 0], sizes = [1, 64], strides = [1, 1]} : vector<64x64xf32> to vector<1x64xf32>
    %346 = vector.broadcast %345 : vector<1x64xf32> to vector<4x64xf32>
    %347 = arith.mulf %96, %346 : vector<4x64xf32>
    %348 = arith.addf %344, %347 : vector<4x64xf32>
    %349 = tpu.concatenate %159, %222, %285, %348 in 0 : vector<4x64xf32>, vector<4x64xf32>, vector<4x64xf32>, vector<4x64xf32> -> vector<16x64xf32>
    %c0_18 = arith.constant 0 : index
    %c0_19 = arith.constant 0 : index
    %350 = vector.load %arg7[%c0_18, %c0_19] : memref<16x1xf32, #tpu.memory_space<vmem>>, vector<16x1xf32>
    %351 = vector.broadcast %350 : vector<16x1xf32> to vector<16x64xf32>
    %352 = arith.mulf %349, %351 : vector<16x64xf32>
    %c0_20 = arith.constant 0 : index
    %c0_21 = arith.constant 0 : index
    %353 = vector.load %arg8[%c0_20, %c0_21] : memref<16x1xf32, #tpu.memory_space<vmem>>, vector<16x1xf32>
    %354 = vector.broadcast %353 : vector<16x1xf32> to vector<16x64xf32>
    %355 = arith.addf %352, %354 : vector<16x64xf32>
    %cst_22 = arith.constant 0.000000e+00 : f32
    %356 = vector.broadcast %cst_22 : f32 to vector<16x64xf32>
    %357 = arith.maximumf %355, %356 : vector<16x64xf32>
    %c0_23 = arith.constant 0 : index
    %c0_24 = arith.constant 0 : index
    %358 = vector.load %arg9[%c0_23, %c0_24] : memref<64x16xbf16, #tpu.memory_space<vmem>>, vector<64x16xbf16>
    %359 = arith.truncf %357 : vector<16x64xf32> to vector<16x64xbf16>
    %cst_25 = arith.constant dense<0.000000e+00> : vector<64x64xf32>
    %360 = tpu.matmul %358, %359, %cst_25 {dimension_numbers = #tpu.dot_dimension_numbers<[1], [0], [0], [1], [0, 0, 1, 1], [], []>} : vector<64x16xbf16>, vector<16x64xbf16>, vector<64x64xf32> -> vector<64x64xf32>
    %c0_26 = arith.constant 0 : index
    %c0_27 = arith.constant 0 : index
    %361 = vector.load %arg10[%c0_26, %c0_27] : memref<64x1xf32, #tpu.memory_space<vmem>>, vector<64x1xf32>
    %362 = vector.broadcast %361 : vector<64x1xf32> to vector<64x64xf32>
    %363 = arith.addf %360, %362 : vector<64x64xf32>
    %364 = arith.addf %363, %1 : vector<64x64xf32>
    %cst_28 = arith.constant 0.000000e+00 : f32
    %365 = vector.broadcast %cst_28 : f32 to vector<64x64xf32>
    %366 = arith.maximumf %364, %365 : vector<64x64xf32>
    %c0_29 = arith.constant 0 : index
    %c0_30 = arith.constant 0 : index
    %c0_31 = arith.constant 0 : index
    %367 = vector.load %arg11[%c0_29, %c0_30, %c0_31] : memref<1x64x64xf32, #tpu.memory_space<vmem>>, vector<1x64x64xf32>
    %368 = vector.shape_cast %367 : vector<1x64x64xf32> to vector<64x64xf32>
    %369 = vector.shape_cast %366 : vector<64x64xf32> to vector<1x64x64xf32>
    tpu.vector_store %arg11[%c0_29, %c0_30, %c0_31], %369 {strides = array<i32>} : memref<1x64x64xf32, #tpu.memory_space<vmem>>, vector<1x64x64xf32>,
    return
  }
  func.func @transform_0(%arg0: i32) -> (i32, i32, i32) {
    %c0_i32 = arith.constant 0 : i32
    %c0_i32_0 = arith.constant 0 : i32
    %c0_i32_1 = arith.constant 0 : i32
    return %arg0, %c0_i32, %c0_i32_0 : i32, i32, i32
  }
  func.func @transform_1(%arg0: i32) -> (i32, i32) {
    %c0_i32 = arith.constant 0 : i32
    %c0_i32_0 = arith.constant 0 : i32
    %c0_i32_1 = arith.constant 0 : i32
    return %c0_i32, %c0_i32_0 : i32, i32
  }
  func.func @transform_2(%arg0: i32) -> (i32, i32) {
    %c0_i32 = arith.constant 0 : i32
    %c0_i32_0 = arith.constant 0 : i32
    %c0_i32_1 = arith.constant 0 : i32
    return %c0_i32, %c0_i32_0 : i32, i32
  }
  func.func @transform_3(%arg0: i32) -> (i32, i32) {
    %c0_i32 = arith.constant 0 : i32
    %c0_i32_0 = arith.constant 0 : i32
    %c0_i32_1 = arith.constant 0 : i32
    return %c0_i32, %c0_i32_0 : i32, i32
  }
  func.func @transform_4(%arg0: i32) -> (i32, i32) {
    %c0_i32 = arith.constant 0 : i32
    %c0_i32_0 = arith.constant 0 : i32
    %c0_i32_1 = arith.constant 0 : i32
    return %c0_i32, %c0_i32_0 : i32, i32
  }
  func.func @transform_5(%arg0: i32) -> (i32, i32) {
    %c0_i32 = arith.constant 0 : i32
    %c0_i32_0 = arith.constant 0 : i32
    %c0_i32_1 = arith.constant 0 : i32
    return %c0_i32, %c0_i32_0 : i32, i32
  }
  func.func @transform_6(%arg0: i32) -> (i32, i32) {
    %c0_i32 = arith.constant 0 : i32
    %c0_i32_0 = arith.constant 0 : i32
    %c0_i32_1 = arith.constant 0 : i32
    return %c0_i32, %c0_i32_0 : i32, i32
  }
  func.func @transform_7(%arg0: i32) -> (i32, i32) {
    %c0_i32 = arith.constant 0 : i32
    %c0_i32_0 = arith.constant 0 : i32
    %c0_i32_1 = arith.constant 0 : i32
    return %c0_i32, %c0_i32_0 : i32, i32
  }
  func.func @transform_8(%arg0: i32) -> (i32, i32) {
    %c0_i32 = arith.constant 0 : i32
    %c0_i32_0 = arith.constant 0 : i32
    %c0_i32_1 = arith.constant 0 : i32
    return %c0_i32, %c0_i32_0 : i32, i32
  }
  func.func @transform_9(%arg0: i32) -> (i32, i32) {
    %c0_i32 = arith.constant 0 : i32
    %c0_i32_0 = arith.constant 0 : i32
    %c0_i32_1 = arith.constant 0 : i32
    return %c0_i32, %c0_i32_0 : i32, i32
  }
  func.func @transform_10(%arg0: i32) -> (i32, i32, i32) {
    %c0_i32 = arith.constant 0 : i32
    %c0_i32_0 = arith.constant 0 : i32
    %c0_i32_1 = arith.constant 0 : i32
    return %arg0, %c0_i32, %c0_i32_0 : i32, i32, i32
  }
}

</mosaic_0001>

<bundles_post_ra>
// kernel: tpu_custom_call.1
= control target key start
LH: loop header
LB: loop body
LE: loop exit
PB: predicated region body
PF: predicated region fallthrough
CT: control target
= control target key end

     0   :  { %15 = vsyncpa [#allocation3], 0  ;;  %s3512_s0 = inlined_call_operand.hbm [shape: f32[2,64,64], index: 0, kind: input, shape index: {}]   ;;  %s3513_s1 = inlined_call_operand.vmem [shape: bf16[16,64], index: 1, kind: input, shape index: {}]   ;;  %s3514_s2 = inlined_call_operand.vmem [shape: f32[16,1], index: 2, kind: input, shape index: {}]   ;;  %s3515_s3 = inlined_call_operand.vmem [shape: bf16[84,16], index: 3, kind: input, shape index: {}]   ;;  %s3516_s4 = inlined_call_operand.vmem [shape: f32[84,1], index: 4, kind: input, shape index: {}]   ;;  %s3517_s5 = inlined_call_operand.vmem [shape: bf16[64,1024], index: 5, kind: input, shape index: {}]   ;;  %s3518_s6 = inlined_call_operand.vmem [shape: f32[16,1], index: 6, kind: input, shape index: {}]   ;;  %s3519_s7 = inlined_call_operand.vmem [shape: f32[16,1], index: 7, kind: input, shape index: {}]   ;;  %s3520_s8 = inlined_call_operand.vmem [shape: bf16[64,16], index: 8, kind: input, shape index: {}]   ;;  %s3521_s9 = inlined_call_operand.vmem [shape: f32[64,1], index: 9, kind: input, shape index: {}]   ;;  %s3522_s10 = inlined_call_operand.hbm [shape: f32[2,64,64], index: 10, kind: output, shape index: {}]  }
   0x1   :  { %17 = vsyncpa [#allocation3 + $0x1], 0 }
   0x2   :  { %18 = vsyncpa [#allocation4], 0 }
   0x3   :  { %20 = vsyncpa [#allocation4 + $0x1], 0  ;;  %s2575_s13 = smov 0   ;;  %s2577_s14 = smov 0  }
   0x4   :  { %s2579_s15 = smov 0   ;;  %s2581_s16 = smov 0  }
   0x5 LB: > { %3528 = sst [smem:[#allocation8_spill]] %s2489_s15  ;;  %s2596_s17 = sadd.s32 4294967295, %s2493_s16   ;;  %s2493_s16 = sphi %s2581_s16, %s3571_s16   ;;  %s2489_s15 = sphi %s2579_s15, %s3573_s15   ;;  %s2485_s14 = sphi %s2577_s14, %s3575_s14   ;;  %s2481_s13 = sphi %s2575_s13, %s3574_s13  }
   0x6   : > { %s2144_s18 = sadd.s32 4294967294, %s2493_s16   ;;  %s2600_s19 = sadd.s32 1, %s2493_s16  }
   0x7   : > { %3529 = sst [smem:[#allocation9_spill]] %s2600_s19  ;;  %s33_s20 = sadd.s32 1, %s2489_s15 }
   0x8   : > { %s30_s21 = ssub.s32 %s2493_s16, %s2600_s19  ;;  %p40_p0 = scmp.ne.s32.totalorder %s2489_s15, %s2485_s14 }
   0x9   : > { %p31_p1 = scmp.eq.s32.totalorder %s30_s21, 0  ;;  %p41_p2 = scmp.eq.s32.totalorder %s2493_s16, 0 }
   0xa   : > { %p46_p3 = scmp.ne.s32.totalorder %s2485_s14, %s2481_s13  ;;  %p47_p4 = scmp.eq.s32.totalorder %s2596_s17, 0 }
   0xb   : > { %s2612_s22 = scalar_select %p31_p1, %s2489_s15, %s33_s20  }
   0xc   : > { %p2614_p5 = por %p41_p2, %p40_p0  ;;  %p2618_p6 = por %p47_p4, %p46_p3 }
   0xd   : > { %3530 = sst [smem:[#allocation10_spill]] %s2612_s22  ;;  %p259_p7 = scmp.eq.s32.totalorder %s2596_s17, 1 }
   0xe   : > { %s3532_s24 = scalar_select %p2618_p6, 1, 0 }
   0xf   : > { %p265_p8 = scmp.eq.s32.totalorder %s2144_s18, 1  ;;  %p2296_p10 = scmp.lt.s32.totalorder %s2493_s16, 2 }
  0x10   : > { %p2625_p11 = por %p259_p7, %p40_p0  ;;  %s312_s27 = sand.u32 1, %s2489_s15  }
  0x11   : > { %p2629_p12 = por %p265_p8, %p46_p3  ;;  %s2219_s28 = sshll.u32 %s2493_s16, 10 }
  0x12   : > { %s3533_s25 = scalar_select %p2625_p11, 1, 0 }
  0x13   : > { %s3534_s26 = scalar_select %p2629_p12, 1, 0 }
  0x14   : > { %s2147_s29 = sshll.u32 %s312_s27, 6  ;;  %s2638_s12 = scalar_lea.hbm %s3512_s0, %s2219_s28 }
  0x15   : > { %s316_s18 = scalar_lea.vmem [#allocation2], %s2147_s29  ;;  %p2642_p13 = pnand %p2296_p10, %p2614_p5 }
  0x16   : > { %s323_s20 = sshll.u32 %s316_s18, 4  ;;  %s2648_s22 = scalar_lea.sflag [#allocation3], %s312_s27  ;;  %s2646_s20 = int_to_ptr.vmem [resolvable:$true] %s323_s20 }
  0x17   : > { %s2401_s15 = scalar_lea.hbm %s2638_s12, 1024  ;;  %p2403_p1 = pneg %p2642_p13 }
  0x18   : > { %p2402_p0 = scmp.ne.s32.totalorder %s2638_s12, %s2401_s15  ;;  %s2406_s29 = scalar_lea.hbm %s3512_s0, 2048 }
  0x19   : > { %p2407_p4 = scmp.lt.s32.totalorder %s2638_s12, %s3512_s0  ;;  %p2408_p5 = scmp.lt.s32.totalorder %s2406_s29, %s2401_s15 }
  0x1a   : > { %p2404_p2 = pnand %p2403_p1, %p2402_p0 }
  0x1b   : > { %p2409_p7 = por %p2408_p5, %p2407_p4 }
  0x1c   : > { %p2405_p3 = pneg %p2404_p2 }
  0x1e   : > { %p2410_p8 = pnand %p2409_p7, %p2405_p3 }
  0x20   : > { %2413 = shalt.err (!%p2410_p8)
}
  0x21   : > { %s2414_s27 = scalar_lea.vmem %s2646_s20, 1024  ;;  %s2495_s18 = smov [#allocation2]  }
  0x22   : > { %p2415_p10 = scmp.ne.s32.totalorder %s2646_s20, %s2414_s27  ;;  %s2419_s19 = sshll.u32 %s2495_s18, 4  ;;  %s2420_s19 = int_to_ptr.vmem [resolvable:$false] %s2419_s19 }
  0x23   : > { %s2421_s28 = scalar_lea.vmem %s2420_s19, 2048  ;;  %p2422_p2 = scmp.lt.s32.totalorder %s2646_s20, %s2420_s19 }
  0x24   : > { %p2417_p9 = pnand %p2415_p10, %p2403_p1  ;;  %p2423_p12 = scmp.lt.s32.totalorder %s2421_s28, %s2414_s27 }
  0x26   : > { %p2418_p0 = pneg %p2417_p9  ;;  %p2424_p11 = por %p2423_p12, %p2422_p2 }
  0x28   : > { %p2425_p6 = pnand %p2424_p11, %p2418_p0 }
  0x2a   : > { %2428 = shalt.err (!%p2425_p6)
}
  0x2b   : > { %s2496_s15 = smov 128   ;;  %s2497_s30 = smov 8  }
  0x2c   : > { %2291 = dma.hbm_to_vmem [thread:$0]  (!%p2642_p13), %s2638_s12, 1024, %s2646_s20, %s2648_s22, %s2496_s15, %s2496_s15, %s2497_s30  }
  0x2d   : > { %p2150_p9 = scmp.ge.s32.totalorder %s2493_s16, 1  ;;  %p331_p1 = scmp.lt.s32.totalorder %s2493_s16, 3 }
  0x2f   : > { %p332_p3 = pnand %p2150_p9, %p331_p1 }
  0x30   : > { %s2672_s19 = sand.u32 (!%p332_p3), 1, %s2485_s14   ;;  %p3536_p6 = scmp.ne.s32.totalorder (!%p332_p3), %s3532_s24, 0 }
  0x31   : > { %335 = sbr.rel (%p332_p3) target bundleno = 1582 (0x62e), region = 60  ;;  %s2151_s29 = sshll.u32 (!%p332_p3), %s2672_s19, 6 }
  0x32   : > { %s338_s23 = scalar_lea.sflag (!%p332_p3), [#allocation3], %s2672_s19  ;;  %s2678_s11 = scalar_lea.vmem (!%p332_p3), [#allocation2], %s2151_s29 }
  0x36   : > { %2472 = dma.done.wait (%p3536_p6), %s338_s23, 1024  }
  0x37   : > { %2474 = vsyncadd (%p3536_p6), %s338_s23, 4294966272  ;;  %v2498_v0 = vmov 0.0   ;;  %vm2499_vm0 = vmmov 0   ;;  %v2500_v1 = vmov 0   ;;  %v385_v2 = vld [vmem:[%s2678_s11 + $0x30] sm:$0xff]  ;;  %v386_v3 = vld [vmem:[%s2678_s11 + $0x38] sm:$0xff] }
  0x38   : > { %2241 = vmatprep.subr.bf16.mxu0 %v2498_v0  ;;  %2249 = vmatprep.mubr.msk.bf16.mxu0 %vm2499_vm0, %v2498_v0  ;;  %v383_v4 = vld [vmem:[%s2678_s11 + $0x20] sm:$0xff]  ;;  %v392_v5 = vpack.c.bf16 %v386_v3, %v385_v2  ;;  %v384_v6 = vld [vmem:[%s2678_s11 + $0x28] sm:$0xff]  ;;  %v381_v7 = vld [vmem:[%s2678_s11 + $0x10] sm:$0xff]  ;;  %vm410_vm1 = vcmask 523264   ;;  %vm563_vm2 = vcmask 130048   ;;  %s2501_s23 = smov 64  }
  0x39   : > { %2353 = vset.pattern.permute.xlu0 %v2500_v1  ;;  %2354 = vset.pattern.permute.xlu1 %v2500_v1  ;;  %v391_v8 = vpack.c.bf16 %v384_v6, %v383_v4  ;;  %v382_v9 = vld [vmem:[%s2678_s11 + $0x18] sm:$0xff]  ;;  %v393_v10 = vld [vmem:[%s3514_s2] sm:$0xff]  ;;  %v394_v11 = vld [vmem:[%s3514_s2 + $0x8] sm:$0xff]  ;;  %vm1846_vm3 = vcmask 1043456   ;;  %s3438_s30 = scalar_lea.vmem [#allocation5], %s2151_s29  ;;  %s2220_s29 = sshll.u32 %s2596_s17, 10 }
  0x3a   : > { %2242 = vmatpush3.bf16.msra.mxu0 %v392_v5  ;;  %397 = vperm.xlu0 %2353, %v393_v10   ;;  %v379_v12 = vld [vmem:[%s2678_s11] sm:$0xff]  ;;  %v380_v13 = vld [vmem:[%s2678_s11 + $0x8] sm:$0xff]  ;;  %v390_v14 = vpack.c.bf16 %v382_v9, %v381_v7  ;;  %v2377_v32 = vld [vmem:[%s3515_s3 + $0x10] sm:$0xff]   ;;  %s3463_s12 = scalar_lea.hbm %s3522_s10, %s2220_s29  ;;  %s2058_s17 = scalar_lea.sflag [#allocation4], %s2672_s19 }
  0x3b   : > { %2243 = vmatprep.subr.bf16.mxu0 %v2498_v0  ;;  %v389_v15 = vpack.c.bf16 %v380_v13, %v379_v12  ;;  %v2374_v16 = vld [vmem:[%s3513_s1] sm:$0xff]   ;;  %v478_v18 = vld [vmem:[%s3516_s4 + $0x48] sm:$0xff]  ;;  %v2378_v33 = vld [vmem:[%s3515_s3 + $0x18] sm:$0xff]   ;;  %p3568_p12 = scmp.ne.s32.totalorder %s3533_s25, 0 }
  0x3c   : > { %v2375_v17 = vld [vmem:[%s3515_s3] sm:$0xff]   ;;  %527 = vperm.xlu1 %2354, %v478_v18   ;;  %v2376_v31 = vld [vmem:[%s3515_s3 + $0x8] sm:$0xff]   ;;  %v790_v9 = vld [vmem:[%s3517_s5 + $0xd0] sm:$0xff]  ;;  %v1204_v18 = vlaneseq }
  0x3d   : > { %2255 = vmatprep.mubr.msk.bf16.mxu1 %vm563_vm2, %v2375_v17  ;;  %v477_v19 = vld [vmem:[%s3516_s4 + $0x40] sm:$0xff]  ;;  %v2380_v35 = vld [vmem:[%s3515_s3 + $0x28] ss:$0 sps:$4 sm:$0x33]   ;;  %v794_v10 = vld [vmem:[%s3517_s5 + $0xf0] sm:$0xff] }
  0x3e   : > { %2244 = vmatpush3.bf16.msra.mxu0 %v391_v8  ;;  %402 = vperm.xlu0 %2353, %v394_v11   ;;  %v2379_v34 = vld [vmem:[%s3515_s3 + $0x20] sm:$0xff]   ;;  %v479_v8 = vld [vmem:[%s3516_s4 + $0x50] sm:$0xf]  ;;  %v2199_v11 = vcombine.high %v790_v9, %v794_v10  ;;  %v2198_v12 = vcombine.low %v790_v9, %v794_v10 }
  0x3f   : > { %2245 = vmatprep.subr.bf16.mxu0 %v2498_v0  ;;  %v788_v36 = vld [vmem:[%s3517_s5 + $0xc0] sm:$0xff]  ;;  %v475_v13 = vld [vmem:[%s3516_s4 + $0x30] sm:$0xff] }
  0x40   : > { %522 = vperm.xlu1 %2354, %v477_v19   ;;  %v792_v37 = vld [vmem:[%s3517_s5 + $0xe0] sm:$0xff] }
  0x41   : > { %v780_v38 = vld [vmem:[%s3517_s5 + $0x80] sm:$0xff]  ;;  %v2194_v39 = vcombine.low %v788_v36, %v792_v37  ;;  %v2195_v40 = vcombine.high %v788_v36, %v792_v37 }
  0x42   : > { %2246 = vmatpush3.bf16.msra.mxu0 %v390_v14  ;;  %v784_v41 = vld [vmem:[%s3517_s5 + $0xa0] sm:$0xff] }
  0x43   : > { %2247 = vmatprep.subr.bf16.mxu0 %v2498_v0  ;;  %v2187_v42 = vcombine.high %v780_v38, %v784_v41  ;;  %v772_v43 = vld [vmem:[%s3517_s5 + $0x40] sm:$0xff]  ;;  %v2186_v45 = vcombine.low %v780_v38, %v784_v41 }
  0x44   : > { %v776_v44 = vld [vmem:[%s3517_s5 + $0x60] sm:$0xff] }
  0x45   : > { %v2179_v46 = vcombine.high %v772_v43, %v776_v44  ;;  %v2178_v47 = vcombine.low %v772_v43, %v776_v44  ;;  %v764_v4 = vld [vmem:[%s3517_s5] sm:$0xff]  ;;  %v770_v43 = vld [vmem:[%s3517_s5 + $0x30] sm:$0xff] }
  0x46   : > { %2248 = vmatpush3.bf16.msra.mxu0 %v389_v15  ;;  %v768_v5 = vld [vmem:[%s3517_s5 + $0x20] sm:$0xff]  ;;  %v472_v15 = vld [vmem:[%s3516_s4 + $0x18] sm:$0xff] }
  0x47   : > { %2267 = vmatprep.subr.mxu0 %v2498_v0  ;;  %v2171_v6 = vcombine.high %v764_v4, %v768_v5  ;;  %v2170_v7 = vcombine.low %v764_v4, %v768_v5  ;;  %v469_v14 = vld [vmem:[%s3516_s4] sm:$0xff] }
  0x49   : > { %2250 = vmatmul.mubr.msk.bf16.vlgmr.msra.gmra.mxu0 %vm410_vm1, %v2374_v16  ;;  %v470_v16 = vld [vmem:[%s3516_s4 + $0x8] sm:$0xff] }
  0x4a   : > { %2271 = vmatprep.mubr.msk.f32.mxu0 %vm2499_vm0, %v2498_v0 }
  0xb5   : > { %v398_v20 = vpop.permute.xlu0 %397 }
  0xb7   : > { %v528_v54 = vpop.permute.xlu1 %527 }
  0xb9   : > { %v403_v24 = vpop.permute.xlu0 %402 }
  0xbb   : > { %v523_v58 = vpop.permute.xlu1 %522 }
 0x109   : > { %v448_v21 = vpop.f32.mrf.mxu0 }
 0x10a   : > { %v449_v23 = vadd.f32 %v448_v21, %v398_v20 }
 0x10b   : > { %v2251_v22 = vpop.f32.mrf.mxu0 }
 0x10c   : > { %v455_v28 = vmax.f32 %v449_v23, 0.0  ;;  %v782_v22 = vld [vmem:[%s3517_s5 + $0x90] sm:$0xff] }
 0x10d   : > { %v451_v25 = vpop.f32.mrf.mxu0  ;;  %v786_v23 = vld [vmem:[%s3517_s5 + $0xb0] sm:$0xff] }
 0x10e   : > { %v452_v26 = vadd.f32 %v451_v25, %v403_v24  ;;  %v2811_v24 = vshrl.u32 %v1204_v18, 7 }
 0x10f   : > { %v2252_v27 = vpop.f32.mrf.mxu0 }
 0x110   : > { %v456_v29 = vmax.f32 %v452_v26, 0.0  ;;  %v2832_v36 = vsub.s32 4, %v2811_v24  ;;  %v2835_v37 = vsub.s32 6, %v2811_v24 }
 0x112   : > { %v468_v30 = vpack.c.bf16 %v456_v29, %v455_v28 }
 0x114   : > { %2253 = vmatprep.subr.bf16.mxu1 %v468_v30 }
 0x115   : > { %2254 = vmatpush3.bf16.msra.mxu1 %v468_v30  ;;  %v2191_v30 = vcombine.high %v782_v22, %v786_v23 }
 0x116   : > { %967 = vmatprep.subr.bf16.mxu1 %v2195_v40 }
 0x118   : > { %2256 = vmatmul.mubr.msk.bf16.vlgmr.msra.gmra.mxu1 %vm563_vm2, %v2376_v31 }
 0x119   : > { %2259 = vmatprep.mubr.msk.bf16.mxu1 %vm563_vm2, %v2377_v32  ;;  %968 = vmatpush1.bf16.msra.mxu1 %v2194_v39  ;;  %v774_v32 = vld [vmem:[%s3517_s5 + $0x50] sm:$0xff]  ;;  %v2190_v39 = vcombine.low %v782_v22, %v786_v23  ;;  %v2909_v22 = vsub.s32 3, %v2811_v24  ;;  %v2912_v23 = vsub.s32 1, %v2811_v24 }
 0x11a   : > { %969 = vmatprep.subr.bf16.mxu1 %v2187_v42  ;;  %v766_v42 = vld [vmem:[%s3517_s5 + $0x10] sm:$0xff] }
 0x11d   : > { %970 = vmatpush1.bf16.msra.mxu1 %v2186_v45 }
 0x11e   : > { %971 = vmatprep.subr.bf16.mxu1 %v2179_v46 }
 0x120   : > { %2260 = vmatmul.mubr.msk.bf16.gmra.mxu1 %vm563_vm2, %v2378_v33  ;;  %v778_v33 = vld [vmem:[%s3517_s5 + $0x70] sm:$0xff] }
 0x121   : > { %2263 = vmatprep.mubr.msk.bf16.mxu1 %vm563_vm2, %v2379_v34  ;;  %972 = vmatpush1.bf16.msra.mxu1 %v2178_v47  ;;  %v2826_v34 = vsub.s32 0, %v2811_v24  ;;  %v2183_v40 = vcombine.high %v774_v32, %v778_v33 }
 0x122   : > { %973 = vmatprep.subr.bf16.mxu1 %v2171_v6 }
 0x125   : > { %974 = vmatpush1.bf16.msra.mxu1 %v2170_v7 }
 0x126   : > { %1049 = vmatprep.subr.bf16.mxu1 %v2199_v11 }
 0x128   : > { %2264 = vmatmul.mubr.msk.bf16.gmra.mxu1 %vm563_vm2, %v2380_v35  ;;  %v2829_v35 = vsub.s32 2, %v2811_v24 }
 0x129   : > { %991 = vmatprep.mubr.bf16.mxu1 %v2500_v1 }
 0x1d8   : > { %v2762_v48 = vpop.f32.mrf.mxu1 }
 0x1da   : > { %v2764_v49 = vpop.f32.mrf.mxu1 }
 0x1dc   : > { %v2766_v50 = vpop.f32.mrf.mxu1 }
 0x1de   : > { %v2768_v51 = vpop.f32.mrf.mxu1 }
 0x1e0   : > { %v2261_v52 = vpop.f32.mrf.mxu1 }
 0x1e2   : > { %v2770_v53 = vpop.f32.mrf.mxu1 }
 0x1e4   : > { %v2772_v55 = vpop.f32.mrf.mxu1 }
 0x1e6   : > { %v2774_v56 = vpop.f32.mrf.mxu1 }
 0x1e8   : > { %v2265_v57 = vpop.f32.mrf.mxu1 }
 0x1ea   : > { %v648_v59 = vpop.f32.mrf.mxu1 }
 0x1eb   : > { %v649_v60 = vadd.f32 %v648_v59, %v523_v58 }
 0x1ec   : > { %v2266_v61 = vpop.f32.mrf.mxu1 }
 0x1ed   : > { %v662_v62 = vsel %vm410_vm1, %v649_v60, -inf }
 0x1ee   : > { %v651_v63 = vpop.f32.mrf.mxu1  ;;  %663 = vmax.xlane.f32.xlu1 %v662_v62 }
 0x1ef   : > { %v652_v2 = vadd.f32 %v651_v63, %v528_v54  ;;  %v2182_v54 = vcombine.low %v774_v32, %v778_v33  ;;  %v2174_v63 = vcombine.low %v766_v42, %v770_v43 }
 0x1f1   : > { %v665_v3 = vsel %vm410_vm1, %v652_v2, -inf }
 0x1f2   : > { %666 = vmax.xlane.f32.xlu0 %v665_v3 }
 0x1ff   : > { %532 = vperm.xlu1 %2354, %v479_v8  }
 0x203   : > { %512 = vperm.xlu1 %2354, %v475_v13  }
 0x207   : > { %482 = vperm.xlu1 %2354, %v469_v14   ;;  %v471_v14 = vld [vmem:[%s3516_s4 + $0x10] sm:$0xff] }
 0x20b   : > { %497 = vperm.xlu1 %2354, %v472_v15   ;;  %v473_v15 = vld [vmem:[%s3516_s4 + $0x20] sm:$0xff] }
 0x20f   : > { %487 = vperm.xlu1 %2354, %v470_v16   ;;  %v476_v16 = vld [vmem:[%s3516_s4 + $0x38] sm:$0xff] }
 0x277   : > { %v664_v17 = vpop.xlane.xlu1 %663 }
 0x278   : > { %v668_v19 = vsub.f32 %v649_v60, %v664_v17  ;;  %v474_v17 = vld [vmem:[%s3516_s4 + $0x28] sm:$0xff] }
 0x27a   : > { %v670_v27 = vmul.f32 1.442695, %v668_v19 }
 0x27b   : > { %v667_v20 = vpop.xlane.xlu0 %666  ;;  %v533_v21 = vpop.permute.xlu1 %532 }
 0x27c   : > { %v669_v25 = vsub.f32 %v652_v2, %v667_v20  ;;  %v2813_v26 = vadd.f32 %v2265_v57, %v533_v21  ;;  %v2175_v57 = vcombine.high %v766_v42, %v770_v43  ;;  %v2936_v42 = vsub.s32 5, %v2811_v24 }
 0x27e   : > { %v672_v28 = vmul.f32 1.442695, %v669_v25  ;;  %v2817_v29 = vpack.c.bf16 %v2813_v26, %v2813_v26 }
 0x27f   : > { %v513_v31 = vpop.permute.xlu1 %512 }
 0x280   : > { %2385 = vpow2.f32 %v672_v28  ;;  %v2837_v38 = vadd.f32 %v2261_v52, %v513_v31  ;;  %2202 = vmatmul.mubr.msk.bf16.vlgmr.msra.gmra.mxu1 %vm410_vm1, %v2817_v29  ;;  %v789_v31 = vld [vmem:[%s3517_s5 + $0xc8] sm:$0xff] }
 0x281   : > { %1050 = vmatpush1.bf16.msra.mxu1 %v2198_v12  ;;  %1073 = vmatprep.mubr.bf16.mxu1 %v2500_v1  ;;  %2387 = vpow2.f32 %v670_v27  ;;  %v2514_v12 = vmov 10  }
 0x282   : > { %1051 = vmatprep.subr.bf16.mxu1 %v2191_v30 }
 0x283   : > { %v483_v41 = vpop.permute.xlu1 %482 }
 0x284   : > { %v2857_v52 = vadd.f32 %v2764_v49, %v483_v41 }
 0x285   : > { %1052 = vmatpush1.bf16.msra.mxu1 %v2190_v39 }
 0x286   : > { %1053 = vmatprep.subr.bf16.mxu1 %v2183_v40 }
 0x287   : > { %v498_v58 = vpop.permute.xlu1 %497 }
 0x288   : > { %v2868_v49 = vadd.f32 %v2766_v50, %v498_v58 }
 0x289   : > { %1054 = vmatpush1.bf16.msra.mxu1 %v2182_v54 }
 0x28a   : > { %1055 = vmatprep.subr.bf16.mxu1 %v2175_v57 }
 0x28b   : > { %v488_v2 = vpop.permute.xlu1 %487 }
 0x28c   : > { %v2877_v6 = vadd.f32 %v2768_v51, %v488_v2  ;;  %v785_v2 = vld [vmem:[%s3517_s5 + $0xa8] sm:$0xff] }
 0x28d   : > { %v2386_v7 = vpop.eup %2385  ;;  %1056 = vmatpush1.bf16.msra.mxu1 %v2174_v63  ;;  %v781_v63 = vld [vmem:[%s3517_s5 + $0x88] sm:$0xff] }
 0x28e   : > { %v677_v8 = vsel %vm410_vm1, %v2386_v7, 0.0  ;;  %v2388_v9 = vpop.eup %2387 }
 0x28f   : > { %678 = vadd.xlane.f32.xlu0 %v677_v8  ;;  %v674_v13 = vsel %vm410_vm1, %v2388_v9, 0.0  ;;  %v1689_v8 = vrot.slane %v2837_v38, %v2912_v23 }
 0x290   : > { %2204 = vmatmul.mubr.msk.bf16.vlgmr.msra.gmra.mxu1 %vm410_vm1, %v2817_v29 }
 0x293   : > { %675 = vadd.xlane.f32.xlu0 %v674_v13 }
 0x2a9   : > { %492 = vperm.xlu0 %2353, %v471_v14  }
 0x2ad   : > { %502 = vperm.xlu0 %2353, %v473_v15  }
 0x2b1   : > { %517 = vperm.xlu0 %2353, %v476_v16   ;;  %v2964_v16 = vsub.s32 7, %v2811_v24  ;;  %v777_v24 = vld [vmem:[%s3517_s5 + $0x68] sm:$0xff] }
 0x2b5   : > { %507 = vperm.xlu0 %2353, %v474_v17  }
 0x318   : > { %v679_v18 = vpop.xlane.xlu0 %678 }
 0x319   : > { %2389 = vrcp.f32 %v679_v18  ;;  %v2189_v18 = vcombine.high %v781_v63, %v785_v2 }
 0x31c   : > { %v676_v19 = vpop.xlane.xlu0 %675 }
 0x31d   : > { %2391 = vrcp.f32 %v676_v19 }
 0x324   : > { %v493_v20 = vpop.permute.xlu0 %492 }
 0x325   : > { %v2906_v21 = vadd.f32 %v2762_v48, %v493_v20  ;;  %v793_v48 = vld [vmem:[%s3517_s5 + $0xe8] sm:$0xff] }
 0x326   : > { %v2390_v25 = vpop.eup %2389  ;;  %v2197_v57 = vcombine.high %v789_v31, %v793_v48  ;;  %v2196_v15 = vcombine.low %v789_v31, %v793_v48  ;;  %v773_v20 = vld [vmem:[%s3517_s5 + $0x48] sm:$0xff]  ;;  %v1252_v31 = vrot.slane %v2857_v52, %v2936_v42 }
 0x327   : > { %v683_v27 = vmul.f32 %v2390_v25, %v2386_v7  ;;  %v1391_v28 = vrot.slane %v2906_v21, %v2909_v22  ;;  %v1371_v30 = vrot.slane %v2906_v21, %v2912_v23  ;;  %v1366_v33 = vrot.slane %v2906_v21, %v2826_v34 }
 0x328   : > { %v503_v32 = vpop.permute.xlu0 %502  ;;  %v1431_v19 = vrot.slane %v2906_v21, %v2964_v16 }
 0x329   : > { %v2931_v41 = vadd.f32 %v2770_v53, %v503_v32  ;;  %2268 = vmatpush3.xpose.msk.msra.mxu0 %vm410_vm1, %v683_v27  ;;  %1393 = vrot.lane.b32.xlu0 %v1391_v28, %s2501_s23  ;;  %v1411_v53 = vrot.slane %v2906_v21, %v2936_v42  ;;  %v2188_v32 = vcombine.low %v781_v63, %v785_v2  ;;  %v2512_v2 = vmov 6  }
 0x32a   : > { %v2392_v54 = vpop.eup %2391  ;;  %1373 = vrot.lane.b32.xlu1 %v1371_v30, %s2501_s23  ;;  %2269 = vmatprep.subr.mxu0 %v2498_v0 }
 0x32b   : > { %v682_v58 = vmul.f32 %v2392_v54, %v2388_v9  ;;  %v1530_v54 = vrot.slane %v2931_v41, %v2912_v23 }
 0x32c   : > { %v518_v7 = vpop.permute.xlu0 %517 }
 0x32d   : > { %v2959_v14 = vadd.f32 %v2772_v55, %v518_v7  ;;  %2270 = vmatpush3.xpose.msk.msra.mxu0 %vm410_vm1, %v682_v58  ;;  %1413 = vrot.lane.b32.xlu0 %v1411_v53, %s2501_s23  ;;  %v1212_v55 = vrot.slane %v2857_v52, %v2912_v23  ;;  %v765_v58 = vld [vmem:[%s3517_s5 + $0x8] sm:$0xff]  ;;  %v1352_v7 = vrot.slane %v2877_v6, %v2964_v16 }
 0x32e   : > { %1691 = vrot.lane.b32.xlu1 %v1689_v8, %s2501_s23  ;;  %1008 = vmatprep.subr.bf16.mxu0 %v2197_v57  ;;  %v1451_v57 = vrot.slane %v2868_v49, %v2912_v23  ;;  %v2180_v8 = vcombine.low %v773_v20, %v777_v24 }
 0x330   : > { %v508_v25 = vpop.permute.xlu0 %507  ;;  %2272 = vmatmul.mubr.msk.f32.vlgmr.msra.gmra.mxu0 %vm410_vm1, %v2813_v26  ;;  %v2181_v26 = vcombine.high %v773_v20, %v777_v24 }
 0x331   : > { %v2990_v48 = vadd.f32 %v2774_v56, %v508_v25  ;;  %1433 = vrot.lane.b32.xlu0 %v1431_v19, %s2501_s23  ;;  %1009 = vmatpush1.bf16.msra.mxu0 %v2196_v15  ;;  %v769_v56 = vld [vmem:[%s3517_s5 + $0x28] sm:$0xff]  ;;  %v791_v19 = vld [vmem:[%s3517_s5 + $0xd8] sm:$0xff]  ;;  %v1709_v25 = vrot.slane %v2837_v38, %v2909_v22 }
 0x332   : > { %1214 = vrot.lane.b32.xlu1 %v1212_v55, %s2501_s23  ;;  %1010 = vmatprep.subr.bf16.mxu0 %v2189_v18  ;;  %v2173_v15 = vcombine.high %v765_v58, %v769_v56  ;;  %v1471_v18 = vrot.slane %v2868_v49, %v2909_v22  ;;  %v795_v55 = vld [vmem:[%s3517_s5 + $0xf8] sm:$0xff]  ;;  %v2172_v20 = vcombine.low %v765_v58, %v769_v56 }
 0x333   : > { %1032 = vmatprep.mubr.bf16.mxu0 %v2500_v1  ;;  %v2201_v24 = vcombine.high %v791_v19, %v795_v55  ;;  %v2200_v58 = vcombine.low %v791_v19, %v795_v55  ;;  %v1550_v19 = vrot.slane %v2931_v41, %v2909_v22 }
 0x335   : > { %1011 = vmatpush1.bf16.msra.mxu0 %v2188_v32  ;;  %1453 = vrot.lane.b32.xlu0 %v1451_v57, %s2501_s23  ;;  %v1491_v32 = vrot.slane %v2868_v49, %v2936_v42  ;;  %v1232_v57 = vrot.slane %v2857_v52, %v2909_v22 }
 0x336   : > { %1532 = vrot.lane.b32.xlu1 %v1530_v54, %s2501_s23  ;;  %1012 = vmatprep.subr.bf16.mxu0 %v2181_v26  ;;  %v783_v26 = vld [vmem:[%s3517_s5 + $0x98] sm:$0xff] }
 0x337   : > { %v787_v54 = vld [vmem:[%s3517_s5 + $0xb8] sm:$0xff] }
 0x338   : > { %v2193_v56 = vcombine.high %v783_v26, %v787_v54  ;;  %v2192_v55 = vcombine.low %v783_v26, %v787_v54  ;;  %v1729_v54 = vrot.slane %v2837_v38, %v2936_v42 }
 0x339   : > { %1013 = vmatpush1.bf16.msra.mxu0 %v2180_v8  ;;  %1473 = vrot.lane.b32.xlu0 %v1471_v18, %s2501_s23  ;;  %v1332_v8 = vrot.slane %v2877_v6, %v2936_v42  ;;  %v779_v18 = vld [vmem:[%s3517_s5 + $0x78] sm:$0xff] }
 0x33a   : > { %1711 = vrot.lane.b32.xlu1 %v1709_v25, %s2501_s23  ;;  %1014 = vmatprep.subr.bf16.mxu0 %v2173_v15  ;;  %v775_v15 = vld [vmem:[%s3517_s5 + $0x58] sm:$0xff] }
 0x33d   : > { %1015 = vmatpush1.bf16.msra.mxu0 %v2172_v20  ;;  %1493 = vrot.lane.b32.xlu0 %v1491_v32, %s2501_s23  ;;  %v1511_v32 = vrot.slane %v2868_v49, %v2964_v16 }
 0x33e   : > { %1234 = vrot.lane.b32.xlu1 %v1232_v57, %s2501_s23  ;;  %1090 = vmatprep.subr.bf16.mxu0 %v2201_v24  ;;  %v2185_v24 = vcombine.high %v775_v15, %v779_v18  ;;  %v767_v57 = vld [vmem:[%s3517_s5 + $0x18] sm:$0xff] }
 0x340   : > { %v3047_v25 = vpop.f32.mrf.mxu1  ;;  %2203 = vmatmul.mubr.msk.bf16.vlgmr.msra.gmra.mxu0 %vm410_vm1, %v2817_v29 }
 0x341   : > { %1091 = vmatpush1.bf16.msra.mxu0 %v2200_v58  ;;  %1334 = vrot.lane.b32.xlu0 %v1332_v8, %s2501_s23  ;;  %v771_v58 = vld [vmem:[%s3517_s5 + $0x38] sm:$0xff] }
 0x342   : > { %1552 = vrot.lane.b32.xlu1 %v1550_v19, %s2501_s23  ;;  %v3055_v20 = vpop.f32.mrf.mxu1  ;;  %1092 = vmatprep.subr.bf16.mxu0 %v2193_v56  ;;  %v2184_v56 = vcombine.low %v775_v15, %v779_v18  ;;  %v2177_v19 = vcombine.high %v767_v57, %v771_v58  ;;  %v1849_v15 = vld [vmem:[%s3518_s6] sm:$0xff]  ;;  %v1570_v18 = vrot.slane %v2931_v41, %v2936_v42 }
 0x343   : > { %1114 = vmatprep.mubr.bf16.mxu0 %v2500_v1 }
 0x344   : > { %v997_v26 = vpop.f32.mrf.mxu1 }
 0x345   : > { %1093 = vmatpush1.bf16.msra.mxu0 %v2192_v55  ;;  %1513 = vrot.lane.b32.xlu0 %v1511_v32, %s2501_s23  ;;  %v2176_v26 = vcombine.low %v767_v57, %v771_v58  ;;  %v1272_v32 = vrot.slane %v2857_v52, %v2964_v16  ;;  %v1590_v58 = vrot.slane %v2931_v41, %v2964_v16 }
 0x346   : > { %1731 = vrot.lane.b32.xlu1 %v1729_v54, %s2501_s23  ;;  %v998_v8 = vpop.f32.mrf.mxu1  ;;  %1094 = vmatprep.subr.bf16.mxu0 %v2185_v24  ;;  %v1292_v54 = vrot.slane %v2877_v6, %v2912_v23 }
 0x347   : > { %v1789_v8 = vrot.slane %v2959_v14, %v2909_v22 }
 0x349   : > { %1095 = vmatpush1.bf16.msra.mxu0 %v2184_v56  ;;  %1354 = vrot.lane.b32.xlu0 %v1352_v7, %s2501_s23  ;;  %v1610_v56 = vrot.slane %v2990_v48, %v2912_v23 }
 0x34a   : > { %1254 = vrot.lane.b32.xlu1 %v1252_v31, %s2501_s23  ;;  %1096 = vmatprep.subr.bf16.mxu0 %v2177_v19  ;;  %v1749_v31 = vrot.slane %v2837_v38, %v2964_v16  ;;  %v1312_v19 = vrot.slane %v2877_v6, %v2909_v22 }
 0x34d   : > { %1097 = vmatpush1.bf16.msra.mxu0 %v2176_v26  ;;  %1853 = vperm.xlu0 %2353, %v1849_v15   ;;  %v1630_v26 = vrot.slane %v2990_v48, %v2909_v22  ;;  %v2502_v15 = vmov 1   ;;  %v1670_v22 = vrot.slane %v2990_v48, %v2964_v16 }
 0x34e   : > { %1572 = vrot.lane.b32.xlu1 %v1570_v18, %s2501_s23  ;;  %v2503_v18 = vmov 3  }
 0x34f   : > { %2355 = vset.pattern.permute.xlu1 %v2502_v15  ;;  %v2507_v15 = vmov 9  }
 0x350   : > { %v3082_v55 = vpop.f32.mrf.mxu1  ;;  %2205 = vmatmul.mubr.msk.bf16.vlgmr.msra.gmra.mxu0 %vm410_vm1, %v2817_v29  ;;  %v1769_v29 = vrot.slane %v2959_v14, %v2912_v23  ;;  %v1809_v23 = vrot.slane %v2959_v14, %v2936_v42 }
 0x351   : > { %2357 = vset.pattern.permute.xlu0 %v2503_v18  ;;  %v2508_v18 = vmov 4  }
 0x352   : > { %v3088_v7 = vpop.f32.mrf.mxu1  ;;  %1751 = vrot.lane.b32.xlu1 %v1749_v31, %s2501_s23  ;;  %v1650_v31 = vrot.slane %v2990_v48, %v2936_v42 }
 0x354   : > { %v1079_v24 = vpop.f32.mrf.mxu1 }
 0x355   : > { %v1829_v24 = vrot.slane %v2959_v14, %v2964_v16  ;;  %v2504_v16 = vmov 5  }
 0x356   : > { %v1080_v57 = vpop.f32.mrf.mxu1  ;;  %1274 = vrot.lane.b32.xlu1 %v1272_v32, %s2501_s23 }
 0x35a   : > { %1592 = vrot.lane.b32.xlu1 %v1590_v58, %s2501_s23 }
 0x35e   : > { %1771 = vrot.lane.b32.xlu1 %v1769_v29, %s2501_s23 }
 0x362   : > { %1294 = vrot.lane.b32.xlu1 %v1292_v54, %s2501_s23  ;;  %v1850_v54 = vld [vmem:[%s3518_s6 + $0x8] sm:$0xff] }
 0x366   : > { %1612 = vrot.lane.b32.xlu1 %v1610_v56, %s2501_s23 }
 0x36a   : > { %1791 = vrot.lane.b32.xlu1 %v1789_v8, %s2501_s23  ;;  %v2505_v8 = vmov 7  }
 0x36e   : > { %1314 = vrot.lane.b32.xlu1 %v1312_v19, %s2501_s23  ;;  %v2506_v19 = vmov 2  }
 0x372   : > { %1632 = vrot.lane.b32.xlu1 %v1630_v26, %s2501_s23 }
 0x376   : > { %1811 = vrot.lane.b32.xlu1 %v1809_v23, %s2501_s23 }
 0x37a   : > { %1652 = vrot.lane.b32.xlu1 %v1650_v31, %s2501_s23 }
 0x37e   : > { %1831 = vrot.lane.b32.xlu1 %v1829_v24, %s2501_s23 }
 0x382   : > { %1672 = vrot.lane.b32.xlu1 %v1670_v22, %s2501_s23  ;;  %v2509_v22 = vmov 11  }
 0x39b   : > { %v1394_v11 = vpop.permute.xlu0 %1393 }
 0x39c   : > { %v3127_v32 = vpop.permute.xlu1 %1373 }
 0x39f   : > { %v1414_v28 = vpop.permute.xlu0 %1413 }
 0x3a0   : > { %v3129_v57 = vpop.permute.xlu1 %1691 }
 0x3a3   : > { %v1434_v10 = vpop.permute.xlu0 %1433 }
 0x3a4   : > { %v3131_v58 = vpop.permute.xlu1 %1214 }
 0x3a7   : > { %v1454_v27 = vpop.permute.xlu0 %1453 }
 0x3a8   : > { %v3141_v56 = vpop.permute.xlu1 %1532 }
 0x3ab   : > { %v1474_v62 = vpop.permute.xlu0 %1473 }
 0x3ac   : > { %v3146_v26 = vpop.permute.xlu1 %1711 }
 0x3b0   : > { %v3152_v31 = vpop.permute.xlu1 %1234 }
 0x3f0   : > { %v3133_v29 = vpop.f32.mrf.mxu0 }
 0x3f1   : > { %1140 = vperm.xlu0 %2357, %v3133_v29   ;;  %1130 = vperm.xlu1 %2355, %v3133_v29  }
 0x3f2   : > { %v2273_v42 = vpop.f32.mrf.mxu0 }
 0x3f5   : > { %2358 = vset.pattern.permute.xlu0 %v2504_v16  ;;  %2356 = vset.pattern.permute.xlu1 %v2500_v1  ;;  %v3158_v16 = vpop.permute.xlu1 %1552 }
 0x3f6   : > { %1150 = vperm.xlu0 %2358, %v3133_v29   ;;  %1858 = vperm.xlu1 %2356, %v1850_v54  }
 0x3fa   : > { %2359 = vset.pattern.permute.xlu0 %v2505_v8  ;;  %2365 = vset.pattern.permute.xlu1 %v2506_v19  ;;  %v2510_v8 = vmov 13   ;;  %v3161_v19 = vpop.permute.xlu1 %1731 }
 0x3fb   : > { %1160 = vperm.xlu0 %2359, %v3133_v29   ;;  %1135 = vperm.xlu1 %2365, %v3133_v29  }
 0x3ff   : > { %2360 = vset.pattern.permute.xlu0 %v2507_v15  ;;  %2366 = vset.pattern.permute.xlu1 %v2508_v18  ;;  %v2511_v15 = vmov 15  }
 0x400   : > { %1170 = vperm.xlu0 %2360, %v3133_v29   ;;  %1145 = vperm.xlu1 %2366, %v3133_v29   ;;  %v3150_v23 = vpop.f32.mrf.mxu0 }
 0x402   : > { %v3154_v24 = vpop.f32.mrf.mxu0 }
 0x404   : > { %2361 = vset.pattern.permute.xlu0 %v2509_v22  ;;  %v1038_v42 = vpop.f32.mrf.mxu0  ;;  %2372 = vset.pattern.permute.xlu1 %v2500_v1 }
 0x405   : > { %1180 = vperm.xlu0 %2361, %v3133_v29   ;;  %v3169_v42 = vpop.permute.xlu1 %1254 }
 0x406   : > { %v1039_v54 = vpop.f32.mrf.mxu0 }
 0x409   : > { %2362 = vset.pattern.permute.xlu0 %v2510_v8  ;;  %v3173_v51 = vpop.permute.xlu1 %1572 }
 0x40a   : > { %1190 = vperm.xlu0 %2362, %v3133_v29  }
 0x40d   : > { %v3176_v30 = vpop.permute.xlu1 %1751 }
 0x40e   : > { %2363 = vset.pattern.permute.xlu0 %v2511_v15  ;;  %v2513_v15 = vmov 8  }
 0x40f   : > { %1200 = vperm.xlu0 %2363, %v3133_v29  }
 0x410   : > { %v3164_v18 = vpop.f32.mrf.mxu0 }
 0x411   : > { %v3179_v63 = vpop.permute.xlu1 %1274 }
 0x412   : > { %v3166_v22 = vpop.f32.mrf.mxu0 }
 0x413   : > { %2364 = vset.pattern.permute.xlu0 %v2500_v1 }
 0x414   : > { %1125 = vperm.xlu0 %2364, %v3133_v29   ;;  %v1120_v54 = vpop.f32.mrf.mxu0 }
 0x415   : > { %v2515_v54 = vmov 12  }
 0x416   : > { %v1121_v8 = vpop.f32.mrf.mxu0 }
 0x417   : > { %v2516_v8 = vmov 14  }
 0x418   : > { %2367 = vset.pattern.permute.xlu0 %v2512_v2  ;;  %v3182_v2 = vpop.permute.xlu1 %1592 }
 0x419   : > { %1155 = vperm.xlu0 %2367, %v3133_v29  }
 0x41d   : > { %2368 = vset.pattern.permute.xlu0 %v2513_v15  ;;  %v3186_v15 = vpop.permute.xlu1 %1771 }
 0x41e   : > { %1165 = vperm.xlu0 %2368, %v3133_v29  }
 0x422   : > { %2369 = vset.pattern.permute.xlu0 %v2514_v12  ;;  %v3188_v12 = vpop.permute.xlu1 %1294 }
 0x423   : > { %1175 = vperm.xlu0 %2369, %v3133_v29  }
 0x426   : > { %v3190_v53 = vpop.permute.xlu1 %1612 }
 0x427   : > { %2370 = vset.pattern.permute.xlu0 %v2515_v54 }
 0x428   : > { %1185 = vperm.xlu0 %2370, %v3133_v29  }
 0x42a   : > { %v3192_v54 = vpop.permute.xlu1 %1791 }
 0x42c   : > { %2371 = vset.pattern.permute.xlu0 %v2516_v8  ;;  %v1494_v8 = vpop.permute.xlu0 %1493 }
 0x42d   : > { %1195 = vperm.xlu0 %2371, %v3133_v29  }
 0x42e   : > { %v1315_v17 = vpop.permute.xlu1 %1314 }
 0x431   : > { %2373 = vset.pattern.permute.xlu0 %v2500_v1  ;;  %v1335_v1 = vpop.permute.xlu0 %1334 }
 0x432   : > { %v3194_v50 = vpop.permute.xlu1 %1632 }
 0x435   : > { %v1514_v13 = vpop.permute.xlu0 %1513 }
 0x436   : > { %v3196_v29 = vpop.permute.xlu1 %1811 }
 0x439   : > { %v3202_v4 = vpop.permute.xlu0 %1354 }
 0x43a   : > { %v3198_v47 = vpop.permute.xlu1 %1652 }
 0x43d   : > { %v3204_v61 = vpop.permute.xlu0 %1853 }
 0x43e   : > { %v3200_v5 = vpop.permute.xlu1 %1831 }
 0x442   : > { %v1673_v3 = vpop.permute.xlu1 %1672 }
 0x46c   : > { %v1141_v46 = vpop.permute.xlu0 %1140  ;;  %v1131_v43 = vpop.permute.xlu1 %1130 }
 0x46d   : > { %v1133_v9 = vadd.f32 %v1131_v43, %v3047_v25  ;;  %v1143_v0 = vadd.f32 %v1141_v46, %v3055_v20 }
 0x46f   : > { %v1694_v40 = vmul.f32 %v3129_v57, %v1133_v9  ;;  %v1376_v60 = vmul.f32 %v3127_v32, %v1133_v9  ;;  %v1396_v39 = vmul.f32 %v1394_v11, %v1143_v0  ;;  %v1217_v44 = vmul.f32 %v3131_v58, %v1133_v9 }
 0x470   : > { %v1535_v57 = vmul.f32 %v3141_v56, %v1133_v9 }
 0x471   : > { %v1151_v59 = vpop.permute.xlu0 %1150  ;;  %1696 = vrot.lane.b32.xlu1 %v1694_v40, %s2501_s23  ;;  %1378 = vrot.lane.b32.xlu0 %v1376_v60, %s2501_s23 }
 0x472   : > { %v1153_v45 = vadd.f32 %v1151_v59, %v3150_v23  ;;  %v1714_v59 = vmul.f32 %v3146_v26, %v1143_v0 }
 0x474   : > { %v1416_v32 = vmul.f32 %v1414_v28, %v1153_v45  ;;  %v1555_v28 = vmul.f32 %v3158_v16, %v1143_v0 }
 0x475   : > { %1398 = vrot.lane.b32.xlu0 %v1396_v39, %s2501_s23  ;;  %1219 = vrot.lane.b32.xlu1 %v1217_v44, %s2501_s23  ;;  %v1237_v39 = vmul.f32 %v3152_v31, %v1143_v0  ;;  %v1575_v0 = vmul.f32 %v3173_v51, %v1153_v45 }
 0x476   : > { %v1161_v43 = vpop.permute.xlu0 %1160 }
 0x477   : > { %v1163_v46 = vadd.f32 %v1161_v43, %v3154_v24  ;;  %v1257_v43 = vmul.f32 %v3169_v42, %v1153_v45 }
 0x479   : > { %1537 = vrot.lane.b32.xlu1 %v1535_v57, %s2501_s23  ;;  %1418 = vrot.lane.b32.xlu0 %v1416_v32, %s2501_s23  ;;  %v1436_v11 = vmul.f32 %v1434_v10, %v1163_v46  ;;  %v1277_v42 = vmul.f32 %v3179_v63, %v1163_v46  ;;  %v1595_v51 = vmul.f32 %v3182_v2, %v1163_v46  ;;  %v1893_v2 = vld [vmem:[%s3521_s9 + $0x28] sm:$0xff] }
 0x47b   : > { %v1171_v60 = vpop.permute.xlu0 %1170 }
 0x47c   : > { %v1173_v40 = vadd.f32 %v1171_v60, %v3082_v55 }
 0x47d   : > { %1716 = vrot.lane.b32.xlu1 %v1714_v59, %s2501_s23  ;;  %1438 = vrot.lane.b32.xlu0 %v1436_v11, %s2501_s23 }
 0x47e   : > { %v1456_v44 = vmul.f32 %v1454_v27, %v1173_v40  ;;  %v1734_v27 = vmul.f32 %v3161_v19, %v1153_v45  ;;  %v1864_v45 = vld [vmem:[%s3519_s7 + $0x8] sm:$0xff]  ;;  %v1297_v63 = vmul.f32 %v3188_v12, %v1173_v40 }
 0x480   : > { %v1181_v58 = vpop.permute.xlu0 %1180 }
 0x481   : > { %v1183_v9 = vadd.f32 %v1181_v58, %v3088_v7  ;;  %1239 = vrot.lane.b32.xlu1 %v1237_v39, %s2501_s23  ;;  %1458 = vrot.lane.b32.xlu0 %v1456_v44, %s2501_s23  ;;  %v1892_v44 = vld [vmem:[%s3521_s9 + $0x20] sm:$0xff]  ;;  %v1894_v39 = vld [vmem:[%s3521_s9 + $0x30] sm:$0xff]  ;;  %v3302_v58 = vpop.permute.xlu1 %1858 }
 0x483   : > { %v1476_v56 = vmul.f32 %v1474_v62, %v1183_v9  ;;  %v1317_v31 = vmul.f32 %v1315_v17, %v1183_v9  ;;  %v1754_v17 = vmul.f32 %v3176_v30, %v1163_v46  ;;  %v1774_v30 = vmul.f32 %v3186_v15, %v1173_v40  ;;  %v1895_v15 = vld [vmem:[%s3521_s9 + $0x38] sm:$0xff] }
 0x484   : > { %v1794_v46 = vmul.f32 %v3192_v54, %v1183_v9  ;;  %v1635_v12 = vmul.f32 %v3194_v50, %v1183_v9  ;;  %v1863_v50 = vld [vmem:[%s3519_s7] sm:$0xff] }
 0x485   : > { %v1191_v10 = vpop.permute.xlu0 %1190  ;;  %1557 = vrot.lane.b32.xlu1 %v1555_v28, %s2501_s23  ;;  %1478 = vrot.lane.b32.xlu0 %v1476_v56, %s2501_s23  ;;  %v1136_v28 = vpop.permute.xlu1 %1135 }
 0x486   : > { %v1193_v26 = vadd.f32 %v1191_v10, %v3164_v18 }
 0x488   : > { %v1496_v57 = vmul.f32 %v1494_v8, %v1193_v26  ;;  %v1337_v16 = vmul.f32 %v1335_v1, %v1193_v26  ;;  %v1615_v1 = vmul.f32 %v3190_v53, %v1173_v40  ;;  %v1814_v60 = vmul.f32 %v3196_v29, %v1193_v26 }
 0x489   : > { %1736 = vrot.lane.b32.xlu1 %v1734_v27, %s2501_s23  ;;  %1319 = vrot.lane.b32.xlu0 %v1317_v31, %s2501_s23  ;;  %v1655_v53 = vmul.f32 %v3198_v47, %v1193_v26  ;;  %v1888_v47 = vld [vmem:[%s3521_s9] sm:$0xff]  ;;  %v1138_v26 = vadd.f32 %v1136_v28, %v3055_v20  ;;  %v1146_v27 = vpop.permute.xlu1 %1145 }
 0x48a   : > { %v1201_v32 = vpop.permute.xlu0 %1200 }
 0x48b   : > { %v1203_v62 = vadd.f32 %v1201_v32, %v3166_v22 }
 0x48d   : > { %1259 = vrot.lane.b32.xlu1 %v1257_v43, %s2501_s23  ;;  %1498 = vrot.lane.b32.xlu0 %v1496_v57, %s2501_s23  ;;  %v1516_v19 = vmul.f32 %v1514_v13, %v1203_v62  ;;  %v1675_v8 = vmul.f32 %v1673_v3, %v1203_v62  ;;  %v1889_v13 = vld [vmem:[%s3521_s9 + $0x8] sm:$0xff]  ;;  %v1891_v3 = vld [vmem:[%s3521_s9 + $0x18] sm:$0xff]  ;;  %v1834_v59 = vmul.f32 %v3200_v5, %v1203_v62 }
 0x48e   : > { %v1357_v54 = vmul.f32 %v3202_v4, %v1203_v62  ;;  %v2381_v5 = vld [vmem:[%s3520_s8] sm:$0xff]   ;;  %v1890_v4 = vld [vmem:[%s3521_s9 + $0x10] sm:$0xff]  ;;  %v3537_v57 = vrot.slane %v2837_v38, %v2826_v34 }
 0x48f   : > { %v1126_v11 = vpop.permute.xlu0 %1125  ;;  %2276 = vmatprep.mubr.msk.bf16.mxu1 %vm563_vm2, %v2381_v5 }
 0x490   : > { %v1128_v10 = vadd.f32 %v1126_v11, %v3047_v25  ;;  %v1148_v25 = vadd.f32 %v1146_v27, %v3150_v23 }
 0x491   : > { %1577 = vrot.lane.b32.xlu1 %v1575_v0, %s2501_s23  ;;  %1339 = vrot.lane.b32.xlu0 %v1337_v16, %s2501_s23  ;;  %v3538_v16 = vrot.slane %v2906_v21, %v2829_v35 }
 0x492   : > { %v1367_v43 = vmul.f32 %v1366_v33, %v1128_v10  ;;  %v1685_v32 = vmul.f32 %v3537_v57, %v1128_v10  ;;  %v3540_v33 = vrot.slane %v2857_v52, %v2826_v34  ;;  %v3546_v57 = vrot.slane %v2837_v38, %v2832_v36 }
 0x494   : > { %v1156_v29 = vpop.permute.xlu0 %1155 }
 0x495   : > { %1756 = vrot.lane.b32.xlu1 %v1754_v17, %s2501_s23  ;;  %1518 = vrot.lane.b32.xlu0 %v1516_v19, %s2501_s23  ;;  %v1386_v17 = vmul.f32 %v3538_v16, %v1138_v26  ;;  %v1158_v23 = vadd.f32 %v1156_v29, %v3154_v24 }
 0x499   : > { %1279 = vrot.lane.b32.xlu1 %v1277_v42, %s2501_s23  ;;  %1677 = vrot.lane.b32.xlu0 %v1675_v8, %s2501_s23  ;;  %v1166_v40 = vpop.permute.xlu0 %1165  ;;  %v3539_v42 = vrot.slane %v2837_v38, %v2829_v35 }
 0x49a   : > { %v1168_v24 = vadd.f32 %v1166_v40, %v3082_v55  ;;  %v3547_v55 = vrot.slane %v2868_v49, %v2826_v34 }
 0x49b   : > { %v1704_v8 = vmul.f32 %v3539_v42, %v1138_v26 }
 0x49c   : > { %v1446_v40 = vmul.f32 %v3547_v55, %v1168_v24  ;;  %v3556_v55 = vrot.slane %v2959_v14, %v2826_v34 }
 0x49d   : > { %1597 = vrot.lane.b32.xlu1 %v1595_v51, %s2501_s23  ;;  %1872 = vperm.xlu0 %2373, %v1864_v45   ;;  %v1208_v51 = vmul.f32 %v3540_v33, %v1128_v10 }
 0x49e   : > { %v1176_v9 = vpop.permute.xlu0 %1175 }
 0x4a1   : > { %1776 = vrot.lane.b32.xlu1 %v1774_v30, %s2501_s23  ;;  %1903 = vperm.xlu0 %2373, %v1889_v13  }
 0x4a3   : > { %v1186_v56 = vpop.permute.xlu0 %1185 }
 0x4a5   : > { %1299 = vrot.lane.b32.xlu1 %v1297_v63, %s2501_s23  ;;  %1913 = vperm.xlu0 %2373, %v1891_v3   ;;  %v3541_v63 = vrot.slane %v2857_v52, %v2829_v35 }
 0x4a8   : > { %v1196_v31 = vpop.permute.xlu0 %1195 }
 0x4a9   : > { %1617 = vrot.lane.b32.xlu1 %v1615_v1, %s2501_s23  ;;  %1923 = vperm.xlu0 %2373, %v1893_v2   ;;  %v1227_v2 = vmul.f32 %v3541_v63, %v1138_v26 }
 0x4ad   : > { %1796 = vrot.lane.b32.xlu1 %v1794_v46, %s2501_s23  ;;  %1933 = vperm.xlu0 %2373, %v1895_v15   ;;  %v3542_v46 = vrot.slane %v2906_v21, %v2832_v36 }
 0x4b1   : > { %1637 = vrot.lane.b32.xlu1 %v1635_v12, %s2501_s23  ;;  %v1406_v12 = vmul.f32 %v3542_v46, %v1148_v25 }
 0x4b5   : > { %1816 = vrot.lane.b32.xlu1 %v1814_v60, %s2501_s23  ;;  %v3543_v60 = vrot.slane %v2931_v41, %v2826_v34 }
 0x4b9   : > { %1657 = vrot.lane.b32.xlu1 %v1655_v53, %s2501_s23  ;;  %v1526_v53 = vmul.f32 %v3543_v60, %v1128_v10 }
 0x4bd   : > { %1836 = vrot.lane.b32.xlu1 %v1834_v59, %s2501_s23 }
 0x4c1   : > { %1359 = vrot.lane.b32.xlu1 %v1357_v54, %s2501_s23  ;;  %s2071_s23 = sshll.u32 %s3438_s30, 4  ;;  %s3465_s23 = int_to_ptr.vmem [resolvable:$true] %s2071_s23 }
 0x4c2   : > { %s2429_s20 = scalar_lea.vmem %s3465_s23, 1024 }
 0x4c3   : > { %p2430_p11 = scmp.ne.s32.totalorder %s3465_s23, %s2429_s20 }
 0x4c5   : > { %1867 = vperm.xlu1 %2372, %v1863_v50   ;;  %p2431_p13 = pnand %p2430_p11, %p3568_p12 }
 0x4c7   : > { %p2432_p4 = pneg %p2431_p13 }
 0x4c9   : > { %1898 = vperm.xlu1 %2372, %v1888_v47   ;;  %v3544_v47 = vrot.slane %v2931_v41, %v2829_v35 }
 0x4cb   : > { %v1545_v5 = vmul.f32 %v3544_v47, %v1138_v26 }
 0x4cd   : > { %1908 = vperm.xlu1 %2372, %v1890_v4  }
 0x4d1   : > { %1918 = vperm.xlu1 %2372, %v1892_v44   ;;  %v3545_v44 = vrot.slane %v2906_v21, %v2835_v37 }
 0x4d5   : > { %1928 = vperm.xlu1 %2372, %v1894_v39   ;;  %v1426_v39 = vmul.f32 %v3545_v44, %v1158_v23 }
 0x4e3   : > { %v1379_v62 = vpop.permute.xlu0 %1378  ;;  %v1697_v0 = vpop.permute.xlu1 %1696 }
 0x4e4   : > { %v1381_v19 = vadd.f32 %v1379_v62, %v1367_v43  ;;  %v1699_v20 = vadd.f32 %v1697_v0, %v1685_v32  ;;  %v1724_v32 = vmul.f32 %v3546_v57, %v1148_v25  ;;  %v3343_v62 = vadd.f32 %v1176_v9, %v3088_v7 }
 0x4e5   : > { %v3549_v9 = vrot.slane %v2868_v49, %v2829_v35 }
 0x4e6   : > { %v1387_v45 = vadd.f32 %v1386_v17, %v1381_v19  ;;  %v1705_v13 = vadd.f32 %v1704_v8, %v1699_v20  ;;  %v3548_v20 = vrot.slane %v2857_v52, %v2832_v36  ;;  %v3352_v8 = vadd.f32 %v1186_v56, %v3164_v18 }
 0x4e7   : > { %v1399_v30 = vpop.permute.xlu0 %1398  ;;  %v1220_v3 = vpop.permute.xlu1 %1219  ;;  %v1466_v33 = vmul.f32 %v3549_v9, %v3343_v62  ;;  %v3551_v18 = vrot.slane %v2931_v41, %v2832_v36 }
 0x4e8   : > { %v1401_v1 = vadd.f32 %v1399_v30, %v1387_v45  ;;  %v1222_v15 = vadd.f32 %v1220_v3, %v1208_v51  ;;  %v1247_v42 = vmul.f32 %v3548_v20, %v1148_v25 }
 0x4e9   : > { %v1565_v56 = vmul.f32 %v3551_v18, %v1148_v25  ;;  %v3561_v18 = vrot.slane %v2990_v48, %v2829_v35 }
 0x4ea   : > { %v1407_v59 = vadd.f32 %v1406_v12, %v1401_v1  ;;  %v1228_v54 = vadd.f32 %v1227_v2, %v1222_v15  ;;  %v3550_v1 = vrot.slane %v2868_v49, %v2832_v36 }
 0x4eb   : > { %v1538_v11 = vpop.permute.xlu1 %1537  ;;  %v1419_v50 = vpop.permute.xlu0 %1418 }
 0x4ec   : > { %v1540_v29 = vadd.f32 %v1538_v11, %v1526_v53  ;;  %v1421_v4 = vadd.f32 %v1419_v50, %v1407_v59  ;;  %v1486_v15 = vmul.f32 %v3550_v1, %v3352_v8  ;;  %v1198_v59 = vadd.f32 %v1196_v31, %v3166_v22 }
 0x4ed   : > { %v3552_v11 = vrot.slane %v2837_v38, %v2835_v37  ;;  %v3555_v38 = vrot.slane %v2931_v41, %v2835_v37  ;;  %v3558_v41 = vrot.slane %v2990_v48, %v2826_v34 }
 0x4ee   : > { %v1427_v28 = vadd.f32 %v1426_v39, %v1421_v4  ;;  %v1546_v27 = vadd.f32 %v1545_v5, %v1540_v29  ;;  %v3553_v39 = vrot.slane %v2868_v49, %v2835_v37  ;;  %v1764_v49 = vmul.f32 %v3556_v55, %v1168_v24 }
 0x4ef   : > { %v1717_v43 = vpop.permute.xlu1 %1716  ;;  %v1439_v10 = vpop.permute.xlu0 %1438  ;;  %v1744_v50 = vmul.f32 %v3552_v11, %v1158_v23  ;;  %v1585_v57 = vmul.f32 %v3555_v38, %v1158_v23  ;;  %v3566_v38 = vrot.slane %v2959_v14, %v2835_v37  ;;  %v3567_v55 = vrot.slane %v2990_v48, %v2835_v37 }
 0x4f0   : > { %v1719_v26 = vadd.f32 %v1717_v43, %v1705_v13  ;;  %v1441_v0 = vadd.f32 %v1439_v10, %v1427_v28  ;;  %v1506_v25 = vmul.f32 %v3553_v39, %v1198_v59  ;;  %v3554_v28 = vrot.slane %v2857_v52, %v2835_v37 }
 0x4f1   : > { %v3557_v52 = vrot.slane %v2877_v6, %v2826_v34 }
 0x4f2   : > { %v1447_v16 = vadd.f32 %v1446_v40, %v1441_v0  ;;  %v1725_v21 = vadd.f32 %v1724_v32, %v1719_v26 }
 0x4f3   : > { %v1240_v17 = vpop.permute.xlu1 %1239  ;;  %v1459_v19 = vpop.permute.xlu0 %1458 }
 0x4f4   : > { %v1242_v45 = vadd.f32 %v1240_v17, %v1228_v54  ;;  %v1461_v7 = vadd.f32 %v1459_v19, %v1447_v16  ;;  %v1287_v17 = vmul.f32 %v3557_v52, %v1168_v24 }
 0x4f6   : > { %v1467_v51 = vadd.f32 %v1466_v33, %v1461_v7  ;;  %v1248_v13 = vadd.f32 %v1247_v42, %v1242_v45  ;;  %v3559_v33 = vrot.slane %v2959_v14, %v2829_v35 }
 0x4f7   : > { %v1558_v30 = vpop.permute.xlu1 %1557  ;;  %v1479_v3 = vpop.permute.xlu0 %1478 }
 0x4f8   : > { %v1560_v63 = vadd.f32 %v1558_v30, %v1546_v27  ;;  %v1481_v2 = vadd.f32 %v1479_v3, %v1467_v51  ;;  %v1267_v27 = vmul.f32 %v3554_v28, %v1158_v23  ;;  %v1605_v23 = vmul.f32 %v3558_v41, %v1168_v24 }
 0x4f9   : > { %v1784_v51 = vmul.f32 %v3559_v33, %v3343_v62  ;;  %v3560_v3 = vrot.slane %v2877_v6, %v2829_v35  ;;  %v3564_v35 = vrot.slane %v2877_v6, %v2835_v37  ;;  %v3565_v28 = vrot.slane %v2990_v48, %v2832_v36 }
 0x4fa   : > { %v1487_v46 = vadd.f32 %v1486_v15, %v1481_v2  ;;  %v1566_v12 = vadd.f32 %v1565_v56, %v1560_v63  ;;  %v1625_v56 = vmul.f32 %v3561_v18, %v3343_v62 }
 0x4fb   : > { %v1737_v60 = vpop.permute.xlu1 %1736  ;;  %v1320_v53 = vpop.permute.xlu0 %1319  ;;  %v1307_v63 = vmul.f32 %v3560_v3, %v3343_v62  ;;  %v1347_v62 = vmul.f32 %v3564_v35, %v1198_v59 }
 0x4fc   : > { %v1739_v54 = vadd.f32 %v1737_v60, %v1725_v21 }
 0x4fe   : > { %v1745_v47 = vadd.f32 %v1744_v50, %v1739_v54 }
 0x4ff   : > { %v1260_v5 = vpop.permute.xlu1 %1259  ;;  %v1499_v29 = vpop.permute.xlu0 %1498 }
 0x500   : > { %v1262_v4 = vadd.f32 %v1260_v5, %v1248_v13  ;;  %v1501_v44 = vadd.f32 %v1499_v29, %v1487_v46  ;;  %v3562_v46 = vrot.slane %v2877_v6, %v2832_v36 }
 0x502   : > { %v1507_v43 = vadd.f32 %v1506_v25, %v1501_v44  ;;  %v1268_v22 = vadd.f32 %v1267_v27, %v1262_v4  ;;  %v1645_v27 = vmul.f32 %v3565_v28, %v3352_v8 }
 0x503   : > { %v1578_v31 = vpop.permute.xlu1 %1577  ;;  %v1340_v11 = vpop.permute.xlu0 %1339 }
 0x504   : > { %v1580_v10 = vadd.f32 %v1578_v31, %v1566_v12  ;;  %v1327_v12 = vmul.f32 %v3562_v46, %v3352_v8 }
 0x506   : > { %v1586_v32 = vadd.f32 %v1585_v57, %v1580_v10  ;;  %v1824_v57 = vmul.f32 %v3566_v38, %v1198_v59 }
 0x507   : > { %v1757_v26 = vpop.permute.xlu1 %1756 }
 0x508   : > { %v1759_v0 = vadd.f32 %v1757_v26, %v1745_v47  ;;  %v1519_v26 = vpop.permute.xlu0 %1518 }
 0x50a   : > { %v1765_v40 = vadd.f32 %v1764_v49, %v1759_v0  ;;  %v1665_v49 = vmul.f32 %v3567_v55, %v1198_v59 }
 0x50b   : > { %v1280_v16 = vpop.permute.xlu1 %1279 }
 0x50c   : > { %v1282_v21 = vadd.f32 %v1280_v16, %v1268_v22 }
 0x50e   : > { %v1288_v19 = vadd.f32 %v1287_v17, %v1282_v21  ;;  %v1521_v21 = vadd.f32 %v1519_v26, %v1507_v43 }
 0x50f   : > { %v1598_v20 = vpop.permute.xlu1 %1597 }
 0x510   : > { %v1600_v42 = vadd.f32 %v1598_v20, %v1586_v32  ;;  %v1841_v20 = vrot.slane %v1521_v21, 4 }
 0x512   : > { %v1606_v45 = vadd.f32 %v1605_v23, %v1600_v42 }
 0x513   : > { %v1777_v7 = vpop.permute.xlu1 %1776 }
 0x514   : > { %v1779_v9 = vadd.f32 %v1777_v7, %v1765_v40 }
 0x516   : > { %v1785_v13 = vadd.f32 %v1784_v51, %v1779_v9  ;;  %v2382_v51 = vld [vmem:[%s3520_s8 + $0x8] sm:$0xff]  }
 0x517   : > { %v1300_v30 = vpop.permute.xlu1 %1299 }
 0x518   : > { %v1302_v2 = vadd.f32 %v1300_v30, %v1288_v19 }
 0x51a   : > { %v1308_v1 = vadd.f32 %v1307_v63, %v1302_v2 }
 0x51b   : > { %v1618_v15 = vpop.permute.xlu1 %1617 }
 0x51c   : > { %v1322_v34 = vadd.f32 %v1320_v53, %v1308_v1  ;;  %v1620_v24 = vadd.f32 %v1618_v15, %v1606_v45  ;;  %v3563_v53 = vrot.slane %v2959_v14, %v2832_v36 }
 0x51e   : > { %v1626_v60 = vadd.f32 %v1625_v56, %v1620_v24  ;;  %v1328_v54 = vadd.f32 %v1327_v12, %v1322_v34  ;;  %v1804_v5 = vmul.f32 %v3563_v53, %v3352_v8  ;;  %v1678_v8 = vpop.permute.xlu0 %1677  ;;  %v2393_v24 = vld [vmem:[%s2678_s11 + $0x10] sm:$0xff] }
 0x51f   : > { %v1797_v50 = vpop.permute.xlu1 %1796 }
 0x520   : > { %v1799_v47 = vadd.f32 %v1797_v50, %v1785_v13  ;;  %v1342_v29 = vadd.f32 %v1340_v11, %v1328_v54 }
 0x522   : > { %v1805_v4 = vadd.f32 %v1804_v5, %v1799_v47  ;;  %v1348_v44 = vadd.f32 %v1347_v62, %v1342_v29  ;;  %v1873_v45 = vpop.permute.xlu0 %1872  ;;  %v2395_v5 = vld [vmem:[%s2678_s11 + $0x18] sm:$0xff] }
 0x523   : > { %v1638_v39 = vpop.permute.xlu1 %1637 }
 0x524   : > { %v1640_v25 = vadd.f32 %v1638_v39, %v1626_v60  ;;  %v2394_v60 = vld [vmem:[%s2678_s11] sm:$0xff]  ;;  %v2396_v39 = vld [vmem:[%s2678_s11 + $0x8] sm:$0xff] }
 0x526   : > { %v1646_v22 = vadd.f32 %v1645_v27, %v1640_v25  ;;  %v1904_v30 = vpop.permute.xlu0 %1903 }
 0x527   : > { %v1817_v31 = vpop.permute.xlu1 %1816 }
 0x528   : > { %v1819_v10 = vadd.f32 %v1817_v31, %v1805_v4  ;;  %v2397_v31 = vld [vmem:[%s2678_s11 + $0x30] sm:$0xff] }
 0x52a   : > { %v1825_v32 = vadd.f32 %v1824_v57, %v1819_v10  ;;  %v1914_v63 = vpop.permute.xlu0 %1913 }
 0x52b   : > { %v1658_v6 = vpop.permute.xlu1 %1657 }
 0x52c   : > { %v1660_v0 = vadd.f32 %v1658_v6, %v1646_v22  ;;  %v2398_v6 = vld [vmem:[%s2678_s11 + $0x20] sm:$0xff] }
 0x52e   : > { %v1666_v40 = vadd.f32 %v1665_v49, %v1660_v0  ;;  %v1924_v50 = vpop.permute.xlu0 %1923 }
 0x52f   : > { %v1837_v16 = vpop.permute.xlu1 %1836 }
 0x530   : > { %v1839_v36 = vadd.f32 %v1837_v16, %v1825_v32  ;;  %v1680_v52 = vadd.f32 %v1678_v8, %v1666_v40  ;;  %v2399_v16 = vld [vmem:[%s2678_s11 + $0x38] sm:$0xff] }
 0x532   : > { %v1844_v17 = vrot.slane %v1839_v36, 4  ;;  %v1934_v57 = vpop.permute.xlu0 %1933 }
 0x533   : > { %v1360_v19 = vpop.permute.xlu1 %1359 }
 0x534   : > { %v1848_v14 = vsel %vm1846_vm3, %v1680_v52, %v1844_v17  ;;  %v1362_v42 = vadd.f32 %v1360_v19, %v1348_v44  ;;  %v2400_v52 = vld [vmem:[%s2678_s11 + $0x28] sm:$0xff]  ;;  %s2517_s11 = smov [#allocation5]  }
 0x535   : > { %v1862_v23 = vmul.f32 %v3302_v58, %v1848_v14  ;;  %v2383_v58 = vld [vmem:[%s3520_s8 + $0x10] sm:$0xff]   ;;  %s2433_s21 = sshll.u32 %s2517_s11, 4  ;;  %s2434_s21 = int_to_ptr.vmem [resolvable:$false] %s2433_s21 }
 0x536   : > { %v1847_v41 = vsel %vm1846_vm3, %v1362_v42, %v1841_v20  ;;  %s2435_s27 = scalar_lea.vmem %s2434_s21, 2048  ;;  %p2436_p5 = scmp.lt.s32.totalorder %s3465_s23, %s2434_s21 }
 0x537   : > { %v1876_v7 = vadd.f32 %v1873_v45, %v1862_v23  ;;  %v1861_v37 = vmul.f32 %v3204_v61, %v1847_v41  ;;  %v2384_v61 = vld [vmem:[%s3520_s8 + $0x18] sm:$0xff]   ;;  %p2437_p7 = scmp.lt.s32.totalorder %s2435_s27, %s2429_s20 }
 0x539   : > { %v1878_v9 = vmax.f32 %v1876_v7, 0.0  ;;  %p2438_p8 = por %p2437_p7, %p2436_p5 }
 0x53b   : > { %p2439_p10 = pnand %p2438_p8, %p2432_p4 }
 0x540   : > { %v1868_v48 = vpop.permute.xlu1 %1867 }
 0x541   : > { %v1875_v59 = vadd.f32 %v1868_v48, %v1861_v37 }
 0x543   : > { %v1877_v43 = vmax.f32 %v1875_v59, 0.0 }
 0x544   : > { %v1899_v13 = vpop.permute.xlu1 %1898 }
 0x545   : > { %v1887_v33 = vpack.c.bf16 %v1878_v9, %v1877_v43 }
 0x547   : > { %2274 = vmatprep.subr.bf16.mxu1 %v1887_v33 }
 0x548   : > { %2275 = vmatpush3.bf16.msra.mxu1 %v1887_v33  ;;  %v1909_v3 = vpop.permute.xlu1 %1908 }
 0x54b   : > { %2277 = vmatmul.mubr.msk.bf16.vlgmr.msra.gmra.mxu1 %vm563_vm2, %v2382_v51 }
 0x54c   : > { %2280 = vmatprep.mubr.msk.bf16.mxu1 %vm563_vm2, %v2383_v58  ;;  %v1919_v15 = vpop.permute.xlu1 %1918 }
 0x550   : > { %v1929_v62 = vpop.permute.xlu1 %1928 }
 0x553   : > { %2281 = vmatmul.mubr.msk.bf16.gmra.mxu1 %vm563_vm2, %v2384_v61 }
 0x60b   : > { %v2278_v2 = vpop.f32.mrf.mxu1 }
 0x60c   : > { %v2011_v1 = vadd.f32 %v2278_v2, %v1909_v3 }
 0x60d   : > { %v2002_v34 = vpop.f32.mrf.mxu1 }
 0x60e   : > { %v2035_v18 = vadd.f32 %v2393_v24, %v2011_v1  ;;  %v2003_v56 = vadd.f32 %v2002_v34, %v1899_v13 }
 0x60f   : > { %v2279_v46 = vpop.f32.mrf.mxu1 }
 0x610   : > { %v2043_v12 = vmax.f32 %v2035_v18, 0.0  ;;  %v2033_v54 = vadd.f32 %v2394_v60, %v2003_v56  ;;  %v2014_v11 = vadd.f32 %v2279_v46, %v1914_v63 }
 0x611   : > { %v2005_v47 = vpop.f32.mrf.mxu1 }
 0x612   : > { %2051 = vst.msk [vmem:[%s3438_s30 + $0x10] sm:$0xff] %vm410_vm1, %v2043_v12  ;;  %v2041_v53 = vmax.f32 %v2033_v54, 0.0  ;;  %v2036_v29 = vadd.f32 %v2395_v5, %v2014_v11  ;;  %v2006_v35 = vadd.f32 %v2005_v47, %v1904_v30 }
 0x613   : > { %v2282_v4 = vpop.f32.mrf.mxu1 }
 0x614   : > { %2049 = vst.msk [vmem:[%s3438_s30] sm:$0xff] %vm410_vm1, %v2041_v53  ;;  %v2044_v44 = vmax.f32 %v2036_v29, 0.0  ;;  %v2034_v25 = vadd.f32 %v2396_v39, %v2006_v35  ;;  %v2027_v28 = vadd.f32 %v2282_v4, %v1929_v62 }
 0x615   : > { %v2018_v27 = vpop.f32.mrf.mxu1 }
 0x616   : > { %2052 = vst.msk [vmem:[%s3438_s30 + $0x18] sm:$0xff] %vm410_vm1, %v2044_v44  ;;  %v2042_v22 = vmax.f32 %v2034_v25, 0.0  ;;  %v2039_v10 = vadd.f32 %v2397_v31, %v2027_v28  ;;  %v2019_v38 = vadd.f32 %v2018_v27, %v1919_v15 }
 0x617   : > { %v2283_v32 = vpop.f32.mrf.mxu1 }
 0x618   : > { %2050 = vst.msk [vmem:[%s3438_s30 + $0x8] sm:$0xff] %vm410_vm1, %v2042_v22  ;;  %v2047_v26 = vmax.f32 %v2039_v10, 0.0  ;;  %v2037_v0 = vadd.f32 %v2398_v6, %v2019_v38  ;;  %v2030_v55 = vadd.f32 %v2283_v32, %v1934_v57 }
 0x619   : > { %v2021_v49 = vpop.f32.mrf.mxu1 }
 0x61a   : > { %2055 = vst.msk [vmem:[%s3438_s30 + $0x30] sm:$0xff] %vm410_vm1, %v2047_v26  ;;  %v2045_v40 = vmax.f32 %v2037_v0, 0.0  ;;  %v2040_v21 = vadd.f32 %v2399_v16, %v2030_v55  ;;  %v2022_v36 = vadd.f32 %v2021_v49, %v1924_v50 }
 0x61c   : > { %2053 = vst.msk [vmem:[%s3438_s30 + $0x20] sm:$0xff] %vm410_vm1, %v2045_v40  ;;  %v2048_v8 = vmax.f32 %v2040_v21, 0.0  ;;  %v2038_v17 = vadd.f32 %v2400_v52, %v2022_v36 }
 0x61e   : > { %2056 = vst.msk [vmem:[%s3438_s30 + $0x38] sm:$0xff] %vm410_vm1, %v2048_v8  ;;  %v2046_v19 = vmax.f32 %v2038_v17, 0.0 }
 0x620   : > { %2054 = vst.msk [vmem:[%s3438_s30 + $0x28] sm:$0xff] %vm410_vm1, %v2046_v19 }
 0x621   : > { %2442 = shalt.err (!%p2439_p10)
}
 0x622   : > { %s2443_s18 = scalar_lea.hbm %s3463_s12, 1024  ;;  %s2447_s30 = scalar_lea.hbm %s3522_s10, 2048 }
 0x623   : > { %p2444_p0 = scmp.ne.s32.totalorder %s3463_s12, %s2443_s18  ;;  %p2448_p1 = scmp.lt.s32.totalorder %s3463_s12, %s3522_s10 }
 0x624   : > { %p2449_p3 = scmp.lt.s32.totalorder %s2447_s30, %s2443_s18 }
 0x625   : > { %p2445_p2 = pnand %p2444_p0, %p3568_p12 }
 0x626   : > { %p2450_p6 = por %p2449_p3, %p2448_p1 }
 0x627   : > { %p2446_p9 = pneg %p2445_p2 }
 0x629   : > { %p2451_p11 = pnand %p2450_p6, %p2446_p9 }
 0x62b   : > { %2454 = shalt.err (!%p2451_p11)
}
 0x62c   : > { %s2518_s24 = smov 128   ;;  %s2519_s20 = smov 8  }
 0x62d   : > { %2286 = dma.vmem_to_hbm [thread:$0]  (%p3568_p12), %s3465_s23, 1024, %s3463_s12, %s2058_s17, %s2518_s24, %s2518_s24, %s2519_s20  }
 0x62e PF: > { %s2086_s11 = sand.u32 1, %s2481_s13   ;;  %p3569_p13 = scmp.ne.s32.totalorder %s3534_s26, 0 }
 0x62f   : > { %p3570_p4 = scmp.ge.s32.totalorder %s2493_s16, 2  ;;  %s2087_s21 = scalar_lea.sflag [#allocation4], %s2086_s11 }
 0x631   : > { %p2293_p5 = pnand %p3570_p4, %p3569_p13 }
 0x633   : > { %p2294_p7 = pneg %p2293_p5 }
 0x635   : > { %2476 = dma.done.wait (%p2294_p7), %s2087_s21, 1024  }
 0x636   : > { %2478 = vsyncadd (%p2294_p7), %s2087_s21, 4294966272  ;;  %s3571_s16 = sld [smem:[#allocation9_spill]]  ;;  %s3574_s13 = smov %s2485_s14 }
 0x637   : > { %s3572_s27 = sld [smem:[#allocation8_spill]] }
 0x638   : > { %s3573_s15 = sld [smem:[#allocation10_spill]] }
 0x63c   : > { %p23_p8 = scmp.ge.s32.totalorder %s3571_s16, 4  }
 0x63d   : > { %s3575_s14 = smov %s3572_s27 }
 0x63e   :  { %25 = sbr.rel (!%p23_p8) target bundleno = 5 (0x5), region = 105 }
 0x643   :  { %2092 = vsyncpa [#allocation3], 1 }
 0x644   :  { %2094 = vsyncpa [#allocation3 + $0x1], 1 }
 0x645   :  { %2095 = vsyncpa [#allocation4], 1 }
 0x646   :  { %2097 = vsyncpa [#allocation4 + $0x1], 1 }

</bundles_post_ra>
